<compile_context>
chip_gen: v5e
topology: v5e:2x2
jax: 0.10.0
libtpu: 0.0.40
codegen_flags: <defaults>
</compile_context>

<pallas_src>
import jax
import jax.numpy as jnp
from jax import lax
from jax.experimental import pallas as pl
from jax.experimental.pallas import tpu as pltpu


def _softplus(x):
    # numerically stable softplus from ops that lower cleanly on TPU
    return jnp.maximum(x, 0.0) + jnp.log(1.0 + jnp.exp(-jnp.abs(x)))


def ntm_read_head_fused_kernel(x_ref, wt_ref, b_ref, mem_ref, minv_ref,
                               winit_ref, read_ref, w_ref):
    # x_ref     : (T*Bp, C)  controller outputs for ALL timesteps (flattened)
    # wt_ref    : (C, P)     fc weight, pre-transposed once at init
    # b_ref     : (1, P)     fc bias
    # mem_ref   : (N, M)     memory matrix (fixed over the sequence)
    # minv_ref  : (1, N)     1 / max(||memory_row||, 1e-8), precomputed
    # winit_ref : (Bp, N)    initial address weights
    # read_ref  : (T*Bp, M)  reads for all timesteps
    # w_ref     : (T*Bp, N)  address weights for all timesteps
    Bp = winit_ref.shape[0]
    TB = x_ref.shape[0]
    T = TB // Bp
    N, M = mem_ref.shape

    # ---- non-recurrent math, hoisted off the serial chain ------------------
    # fc_read_parameters for ALL timesteps: one (TB, C)@(C, P) MXU matmul.
    params = jnp.dot(x_ref[...], wt_ref[...],
                     preferred_element_type=jnp.float32) + b_ref[...]       # (TB, P)

    # _split_cols([M, 1, 1, 3, 1]) + activations
    k     = params[:, :M]                                    # key vector   (TB, M)
    beta  = _softplus(params[:, M:M + 1])                    # key strength (TB, 1)
    g     = jax.nn.sigmoid(params[:, M + 1:M + 2])           # interp gate  (TB, 1)
    s_raw = params[:, M + 2:M + 5]                           # shift logits (TB, 3)
    gamma = 1.0 + _softplus(params[:, M + 5:M + 6])          # sharpening   (TB, 1)

    # softmax over the 3 shift logits (approx reciprocal -> EUP slot)
    s_exp = jnp.exp(s_raw - jnp.max(s_raw, axis=1, keepdims=True))
    s = s_exp * pl.reciprocal(jnp.sum(s_exp, axis=1, keepdims=True), approx=True)

    # content addressing for ALL timesteps: softmax(beta * cosine_sim(k, mem))
    mem = mem_ref[...]                                                       # (N, M)
    dots = lax.dot_general(k, mem, (((1,), (1,)), ((), ())),
                           preferred_element_type=jnp.float32)               # (TB, N)
    inv_k_norm = lax.rsqrt(jnp.maximum(jnp.sum(k * k, axis=1, keepdims=True),
                                       1e-16))               # ||k|| clamped at 1e-8
    z = beta * (dots * inv_k_norm * minv_ref[...])
    z_exp = jnp.exp(z - jnp.max(z, axis=1, keepdims=True))
    wc = z_exp * pl.reciprocal(jnp.sum(z_exp, axis=1, keepdims=True), approx=True)

    # ---- the recurrence: interpolation -> 3-tap shift -> sharpening --------
    # Fully unrolled (T is small and static); only a few VPU/XLU/EUP ops on a
    # single (Bp, N) tile remain on the serial dependency chain per step.
    w_prev = winit_ref[...]                                                  # (Bp, N)
    w_steps = []
    for t in range(T):
        lo, hi = t * Bp, (t + 1) * Bp
        gt = g[lo:hi]
        wg = gt * wc[lo:hi] + (1.0 - gt) * w_prev                            # (Bp, N)

        # circular convolution with the 3-tap shift distribution
        # TODO(synk): tap ordering assumes s[:,0]<->shift -1, s[:,2]<->shift +1
        #             (pytorch-ntm convention); flip if the Memory class differs.
        w_m1 = pltpu.roll(wg, 1, axis=1)        # wg[(i-1) mod N]
        w_p1 = pltpu.roll(wg, N - 1, axis=1)    # wg[(i+1) mod N]
        st = s[lo:hi]
        w_sh = w_m1 * st[:, 0:1] + wg * st[:, 1:2] + w_p1 * st[:, 2:3]

        # sharpening: w^gamma / (sum(w^gamma) + 1e-16).  Exact divide here so
        # approx-reciprocal error does not compound through the recurrence.
        wpow = jnp.exp(gamma[lo:hi] * jnp.log(jnp.maximum(w_sh, 1e-30)))
        w = wpow / (jnp.sum(wpow, axis=1, keepdims=True) + 1e-16)

        w_steps.append(w)
        w_prev = w

    w_all = jnp.concatenate(w_steps, axis=0)                                 # (TB, N)
    w_ref[...] = w_all
    # batched read: one (TB, N)@(N, M) matmul instead of T tiny per-step dots
    read_ref[...] = jnp.dot(w_all, mem, preferred_element_type=jnp.float32)  # (TB, M)


def init_ntm_read_head_params(key, address_count, address_dimension,
                              controller_output_size):
    """Parameter init mirroring reset_parameters(); layout work hoisted here."""
    N, M, C = address_count, address_dimension, controller_output_size
    P = M + 1 + 1 + 3 + 1
    k_w, k_b = jax.random.split(key, 2)
    # xavier_uniform(gain=1.4) for fc weight, normal(std=0.01) for fc bias
    bound = 1.4 * (6.0 / (C + P)) ** 0.5
    fc_weight = jax.random.uniform(k_w, (P, C), jnp.float32, -bound, bound)
    fc_bias = 0.01 * jax.random.normal(k_b, (P,), jnp.float32)
    # hoisted once: pre-transpose + reshape + cast at init time, not per call.
    fc_weight_t = jnp.asarray(fc_weight.T, jnp.float32)          # (C, P)
    fc_bias_2d = jnp.asarray(fc_bias.reshape(1, P), jnp.float32)  # (1, P)
    initial_address_vec = jnp.zeros((N,), jnp.float32)
    return fc_weight_t, fc_bias_2d, initial_address_vec


def ntm_read_head_forward_seq(x_seq, fc_weight_t, fc_bias_2d, memory, w_init):
    """Run T read-head steps in ONE fused, grid-less pallas_call.

    x_seq       : (T, B, C) controller outputs per timestep
    fc_weight_t : (C, P)    pre-transposed fc weight (P = M + 6)
    fc_bias_2d  : (1, P)
    memory      : (N, M)    external memory, fixed over the sequence
    w_init      : (B, N)    initial address weights
    returns     : reads (T, B, M), address weights (T, B, N)
    """
    T, B, C = x_seq.shape
    N, M = memory.shape
    P = fc_weight_t.shape[1]
    assert P == M + 1 + 1 + 3 + 1

    # pad batch once per sequence to a full f32 sublane group (8 rows)
    Bp = -(-B // 8) * 8
    if Bp != B:
        x_seq = jnp.pad(x_seq, ((0, 0), (0, Bp - B), (0, 0)))
        w_init = jnp.pad(w_init, ((0, Bp - B), (0, 0)))

    x_flat = jnp.asarray(x_seq, jnp.float32).reshape(T * Bp, C)
    memory = jnp.asarray(memory, jnp.float32)
    # inverse memory row norms (clamped at 1e-8, torch.cosine_similarity-style),
    # computed once per sequence.
    m_inv = 1.0 / jnp.maximum(
        jnp.sqrt(jnp.sum(memory * memory, axis=1, keepdims=True)).T, 1e-8)   # (1, N)

    # No grid: everything (a few tens of KB) is VMEM-resident for the whole
    # kernel; outputs are written back by two DMAs at the end.
    reads, ws = pl.pallas_call(
        ntm_read_head_fused_kernel,
        out_shape=(jax.ShapeDtypeStruct((T * Bp, M), jnp.float32),
                   jax.ShapeDtypeStruct((T * Bp, N), jnp.float32)),
    )(x_flat, fc_weight_t, fc_bias_2d, memory, m_inv,
      jnp.asarray(w_init, jnp.float32))

    reads = reads.reshape(T, Bp, M)[:, :B, :]
    ws = ws.reshape(T, Bp, N)[:, :B, :]
    return reads, ws


if __name__ == "__main__":
    # small shapes consistent with the module
    B = 2            # batch_size
    C = 32           # controller_output_size
    N = 16           # address_count
    M = 8            # address_dimension
    T = 8            # number of recurrent timesteps fused into one call
    P = M + 1 + 1 + 3 + 1   # 14 read-parameter columns

    key = jax.random.PRNGKey(0)
    k_params, k_x, k_mem = jax.random.split(key, 3)

    fc_weight_t, fc_bias_2d, initial_address_vec = init_ntm_read_head_params(
        k_params, N, M, C)

    # state: initial_address_vec = zeros(N) -> broadcast to (B, N)
    w_init = jnp.broadcast_to(initial_address_vec, (B, N)).astype(jnp.float32)

    # inputs: controller outputs for T steps and the external memory matrix
    x_seq = jax.random.normal(k_x, (T, B, C), jnp.float32)
    memory = jax.random.normal(k_mem, (N, M), jnp.float32)

    fwd = jax.jit(ntm_read_head_forward_seq)
    reads, w_seq = fwd(x_seq, fc_weight_t, fc_bias_2d, memory, w_init)
    reads = jax.block_until_ready(reads)
    w_seq = jax.block_until_ready(w_seq)

    assert reads.shape == (T, B, M)
    assert w_seq.shape == (T, B, N)
    assert bool(jnp.all(jnp.isfinite(reads)))
    assert bool(jnp.all(jnp.isfinite(w_seq)))
    # address weights must be a valid distribution over N slots at every step
    # (final normalization uses an exact divide, so this is tight)
    assert bool(jnp.all(jnp.abs(jnp.sum(w_seq, axis=-1) - 1.0) < 1e-3))

    print("KERNEL_OK")
</pallas_src>

<mosaic_0001>
module attributes {stable_mosaic.version = 11 : i64} {
  func.func @ntm_read_head_fused_kernel(%arg0: memref<64x32xf32, #tpu.memory_space<vmem>>, %arg1: memref<32x14xf32, #tpu.memory_space<vmem>>, %arg2: memref<1x14xf32, #tpu.memory_space<vmem>>, %arg3: memref<16x8xf32, #tpu.memory_space<vmem>>, %arg4: memref<1x16xf32, #tpu.memory_space<vmem>>, %arg5: memref<8x16xf32, #tpu.memory_space<vmem>>, %arg6: memref<64x8xf32, #tpu.memory_space<vmem>>, %arg7: memref<64x16xf32, #tpu.memory_space<vmem>>) attributes {dimension_semantics = [], scalar_prefetch = 0 : i64, scratch_operands = 0 : i64, tpu.core_type = #tpu.core_type<tc>} {
    %c0 = arith.constant 0 : index
    %c0_0 = arith.constant 0 : index
    %0 = vector.load %arg0[%c0, %c0_0] : memref<64x32xf32, #tpu.memory_space<vmem>>, vector<64x32xf32>
    %c0_1 = arith.constant 0 : index
    %c0_2 = arith.constant 0 : index
    %1 = vector.load %arg1[%c0_1, %c0_2] : memref<32x14xf32, #tpu.memory_space<vmem>>, vector<32x14xf32>
    %cst = arith.constant dense<0.000000e+00> : vector<64x14xf32>
    %2 = tpu.matmul %0, %1, %cst {dimension_numbers = #tpu.dot_dimension_numbers<[1], [0], [0], [1], [0, 0, 1, 1], [], []>} : vector<64x32xf32>, vector<32x14xf32>, vector<64x14xf32> -> vector<64x14xf32>
    %c0_3 = arith.constant 0 : index
    %c0_4 = arith.constant 0 : index
    %3 = vector.load %arg2[%c0_3, %c0_4] : memref<1x14xf32, #tpu.memory_space<vmem>>, vector<1x14xf32>
    %4 = vector.broadcast %3 : vector<1x14xf32> to vector<64x14xf32>
    %5 = arith.addf %2, %4 : vector<64x14xf32>
    %6 = vector.extract_strided_slice %5 {offsets = [0, 0], sizes = [64, 8], strides = [1, 1]} : vector<64x14xf32> to vector<64x8xf32>
    %7 = vector.extract_strided_slice %5 {offsets = [0, 8], sizes = [64, 1], strides = [1, 1]} : vector<64x14xf32> to vector<64x1xf32>
    %cst_5 = arith.constant 0.000000e+00 : f32
    %8 = vector.broadcast %cst_5 : f32 to vector<64x1xf32>
    %9 = arith.maximumf %7, %8 : vector<64x1xf32>
    %10 = math.absf %7 : vector<64x1xf32>
    %cst_6 = arith.constant 0.000000e+00 : f32
    %11 = vector.broadcast %cst_6 : f32 to vector<64x1xf32>
    %12 = arith.subf %11, %10 : vector<64x1xf32>
    %13 = math.exp %12 : vector<64x1xf32>
    %cst_7 = arith.constant 1.000000e+00 : f32
    %14 = vector.broadcast %cst_7 : f32 to vector<64x1xf32>
    %15 = arith.addf %14, %13 : vector<64x1xf32>
    %16 = math.log %15 : vector<64x1xf32>
    %17 = arith.addf %9, %16 : vector<64x1xf32>
    %18 = vector.extract_strided_slice %5 {offsets = [0, 9], sizes = [64, 1], strides = [1, 1]} : vector<64x14xf32> to vector<64x1xf32>
    %19 = arith.negf %18 : vector<64x1xf32>
    %20 = math.exp %19 : vector<64x1xf32>
    %cst_8 = arith.constant 1.000000e+00 : f32
    %21 = vector.broadcast %cst_8 : f32 to vector<64x1xf32>
    %22 = arith.addf %21, %20 : vector<64x1xf32>
    %23 = arith.divf %21, %22 : vector<64x1xf32>
    %24 = vector.extract_strided_slice %5 {offsets = [0, 10], sizes = [64, 3], strides = [1, 1]} : vector<64x14xf32> to vector<64x3xf32>
    %25 = vector.extract_strided_slice %5 {offsets = [0, 13], sizes = [64, 1], strides = [1, 1]} : vector<64x14xf32> to vector<64x1xf32>
    %cst_9 = arith.constant 0.000000e+00 : f32
    %26 = vector.broadcast %cst_9 : f32 to vector<64x1xf32>
    %27 = arith.maximumf %25, %26 : vector<64x1xf32>
    %28 = math.absf %25 : vector<64x1xf32>
    %cst_10 = arith.constant 0.000000e+00 : f32
    %29 = vector.broadcast %cst_10 : f32 to vector<64x1xf32>
    %30 = arith.subf %29, %28 : vector<64x1xf32>
    %31 = math.exp %30 : vector<64x1xf32>
    %cst_11 = arith.constant 1.000000e+00 : f32
    %32 = vector.broadcast %cst_11 : f32 to vector<64x1xf32>
    %33 = arith.addf %32, %31 : vector<64x1xf32>
    %34 = math.log %33 : vector<64x1xf32>
    %35 = arith.addf %27, %34 : vector<64x1xf32>
    %cst_12 = arith.constant 1.000000e+00 : f32
    %36 = vector.broadcast %cst_12 : f32 to vector<64x1xf32>
    %37 = arith.addf %36, %35 : vector<64x1xf32>
    %cst_13 = arith.constant dense<0xFF800000> : vector<64xf32>
    %38 = vector.multi_reduction <maximumf>, %24, %cst_13 [1] : vector<64x3xf32> to vector<64xf32>
    %39 = vector.shape_cast %38 : vector<64xf32> to vector<64x1xf32>
    %40 = vector.broadcast %39 : vector<64x1xf32> to vector<64x3xf32>
    %41 = arith.subf %24, %40 : vector<64x3xf32>
    %42 = math.exp %41 : vector<64x3xf32>
    %cst_14 = arith.constant dense<0.000000e+00> : vector<64xf32>
    %43 = vector.multi_reduction <add>, %42, %cst_14 [1] : vector<64x3xf32> to vector<64xf32>
    %44 = vector.shape_cast %43 : vector<64xf32> to vector<64x1xf32>
    %45 = tpu.reciprocal %44 {approx = true} : vector<64x1xf32> -> vector<64x1xf32>
    %46 = vector.broadcast %45 : vector<64x1xf32> to vector<64x3xf32>
    %47 = arith.mulf %42, %46 : vector<64x3xf32>
    %c0_15 = arith.constant 0 : index
    %c0_16 = arith.constant 0 : index
    %48 = vector.load %arg3[%c0_15, %c0_16] : memref<16x8xf32, #tpu.memory_space<vmem>>, vector<16x8xf32>
    %cst_17 = arith.constant dense<0.000000e+00> : vector<64x16xf32>
    %49 = tpu.matmul %6, %48, %cst_17 {dimension_numbers = #tpu.dot_dimension_numbers<[1], [1], [0], [0], [0, 0, 1, 0], [], []>} : vector<64x8xf32>, vector<16x8xf32>, vector<64x16xf32> -> vector<64x16xf32>
    %50 = arith.mulf %6, %6 : vector<64x8xf32>
    %cst_18 = arith.constant dense<0.000000e+00> : vector<64xf32>
    %51 = vector.multi_reduction <add>, %50, %cst_18 [1] : vector<64x8xf32> to vector<64xf32>
    %52 = vector.shape_cast %51 : vector<64xf32> to vector<64x1xf32>
    %cst_19 = arith.constant 1.000000e-16 : f32
    %53 = vector.broadcast %cst_19 : f32 to vector<64x1xf32>
    %54 = arith.maximumf %52, %53 : vector<64x1xf32>
    %55 = math.rsqrt %54 : vector<64x1xf32>
    %56 = vector.broadcast %55 : vector<64x1xf32> to vector<64x16xf32>
    %57 = arith.mulf %49, %56 : vector<64x16xf32>
    %c0_20 = arith.constant 0 : index
    %c0_21 = arith.constant 0 : index
    %58 = vector.load %arg4[%c0_20, %c0_21] : memref<1x16xf32, #tpu.memory_space<vmem>>, vector<1x16xf32>
    %59 = vector.broadcast %58 : vector<1x16xf32> to vector<64x16xf32>
    %60 = arith.mulf %57, %59 : vector<64x16xf32>
    %61 = vector.broadcast %17 : vector<64x1xf32> to vector<64x16xf32>
    %62 = arith.mulf %61, %60 : vector<64x16xf32>
    %cst_22 = arith.constant dense<0xFF800000> : vector<64xf32>
    %63 = vector.multi_reduction <maximumf>, %62, %cst_22 [1] : vector<64x16xf32> to vector<64xf32>
    %64 = vector.shape_cast %63 : vector<64xf32> to vector<64x1xf32>
    %65 = vector.broadcast %64 : vector<64x1xf32> to vector<64x16xf32>
    %66 = arith.subf %62, %65 : vector<64x16xf32>
    %67 = math.exp %66 : vector<64x16xf32>
    %cst_23 = arith.constant dense<0.000000e+00> : vector<64xf32>
    %68 = vector.multi_reduction <add>, %67, %cst_23 [1] : vector<64x16xf32> to vector<64xf32>
    %69 = vector.shape_cast %68 : vector<64xf32> to vector<64x1xf32>
    %70 = tpu.reciprocal %69 {approx = true} : vector<64x1xf32> -> vector<64x1xf32>
    %71 = vector.broadcast %70 : vector<64x1xf32> to vector<64x16xf32>
    %72 = arith.mulf %67, %71 : vector<64x16xf32>
    %c0_24 = arith.constant 0 : index
    %c0_25 = arith.constant 0 : index
    %73 = vector.load %arg5[%c0_24, %c0_25] : memref<8x16xf32, #tpu.memory_space<vmem>>, vector<8x16xf32>
    %74 = vector.extract_strided_slice %23 {offsets = [0, 0], sizes = [8, 1], strides = [1, 1]} : vector<64x1xf32> to vector<8x1xf32>
    %75 = vector.extract_strided_slice %72 {offsets = [0, 0], sizes = [8, 16], strides = [1, 1]} : vector<64x16xf32> to vector<8x16xf32>
    %76 = vector.broadcast %74 : vector<8x1xf32> to vector<8x16xf32>
    %77 = arith.mulf %76, %75 : vector<8x16xf32>
    %cst_26 = arith.constant 1.000000e+00 : f32
    %78 = vector.broadcast %cst_26 : f32 to vector<8x1xf32>
    %79 = arith.subf %78, %74 : vector<8x1xf32>
    %80 = vector.broadcast %79 : vector<8x1xf32> to vector<8x16xf32>
    %81 = arith.mulf %80, %73 : vector<8x16xf32>
    %82 = arith.addf %77, %81 : vector<8x16xf32>
    %c1_i32 = arith.constant 1 : i32
    %83 = tpu.dynamic_rotate %82 by %c1_i32 dim 1 : vector<8x16xf32>, i32 -> vector<8x16xf32>
    %c15_i32 = arith.constant 15 : i32
    %84 = tpu.dynamic_rotate %82 by %c15_i32 dim 1 : vector<8x16xf32>, i32 -> vector<8x16xf32>
    %85 = vector.extract_strided_slice %47 {offsets = [0, 0], sizes = [8, 3], strides = [1, 1]} : vector<64x3xf32> to vector<8x3xf32>
    %86 = vector.extract_strided_slice %85 {offsets = [0, 0], sizes = [8, 1], strides = [1, 1]} : vector<8x3xf32> to vector<8x1xf32>
    %87 = vector.broadcast %86 : vector<8x1xf32> to vector<8x16xf32>
    %88 = arith.mulf %83, %87 : vector<8x16xf32>
    %89 = vector.extract_strided_slice %85 {offsets = [0, 1], sizes = [8, 1], strides = [1, 1]} : vector<8x3xf32> to vector<8x1xf32>
    %90 = vector.broadcast %89 : vector<8x1xf32> to vector<8x16xf32>
    %91 = arith.mulf %82, %90 : vector<8x16xf32>
    %92 = arith.addf %88, %91 : vector<8x16xf32>
    %93 = vector.extract_strided_slice %85 {offsets = [0, 2], sizes = [8, 1], strides = [1, 1]} : vector<8x3xf32> to vector<8x1xf32>
    %94 = vector.broadcast %93 : vector<8x1xf32> to vector<8x16xf32>
    %95 = arith.mulf %84, %94 : vector<8x16xf32>
    %96 = arith.addf %92, %95 : vector<8x16xf32>
    %97 = vector.extract_strided_slice %37 {offsets = [0, 0], sizes = [8, 1], strides = [1, 1]} : vector<64x1xf32> to vector<8x1xf32>
    %cst_27 = arith.constant 1.000000e-30 : f32
    %98 = vector.broadcast %cst_27 : f32 to vector<8x16xf32>
    %99 = arith.maximumf %96, %98 : vector<8x16xf32>
    %100 = math.log %99 : vector<8x16xf32>
    %101 = vector.broadcast %97 : vector<8x1xf32> to vector<8x16xf32>
    %102 = arith.mulf %101, %100 : vector<8x16xf32>
    %103 = math.exp %102 : vector<8x16xf32>
    %cst_28 = arith.constant dense<0.000000e+00> : vector<8xf32>
    %104 = vector.multi_reduction <add>, %103, %cst_28 [1] : vector<8x16xf32> to vector<8xf32>
    %105 = vector.shape_cast %104 : vector<8xf32> to vector<8x1xf32>
    %cst_29 = arith.constant 1.000000e-16 : f32
    %106 = vector.broadcast %cst_29 : f32 to vector<8x1xf32>
    %107 = arith.addf %105, %106 : vector<8x1xf32>
    %108 = vector.broadcast %107 : vector<8x1xf32> to vector<8x16xf32>
    %109 = arith.divf %103, %108 : vector<8x16xf32>
    %110 = vector.extract_strided_slice %23 {offsets = [8, 0], sizes = [8, 1], strides = [1, 1]} : vector<64x1xf32> to vector<8x1xf32>
    %111 = vector.extract_strided_slice %72 {offsets = [8, 0], sizes = [8, 16], strides = [1, 1]} : vector<64x16xf32> to vector<8x16xf32>
    %112 = vector.broadcast %110 : vector<8x1xf32> to vector<8x16xf32>
    %113 = arith.mulf %112, %111 : vector<8x16xf32>
    %cst_30 = arith.constant 1.000000e+00 : f32
    %114 = vector.broadcast %cst_30 : f32 to vector<8x1xf32>
    %115 = arith.subf %114, %110 : vector<8x1xf32>
    %116 = vector.broadcast %115 : vector<8x1xf32> to vector<8x16xf32>
    %117 = arith.mulf %116, %109 : vector<8x16xf32>
    %118 = arith.addf %113, %117 : vector<8x16xf32>
    %c1_i32_31 = arith.constant 1 : i32
    %119 = tpu.dynamic_rotate %118 by %c1_i32_31 dim 1 : vector<8x16xf32>, i32 -> vector<8x16xf32>
    %c15_i32_32 = arith.constant 15 : i32
    %120 = tpu.dynamic_rotate %118 by %c15_i32_32 dim 1 : vector<8x16xf32>, i32 -> vector<8x16xf32>
    %121 = vector.extract_strided_slice %47 {offsets = [8, 0], sizes = [8, 3], strides = [1, 1]} : vector<64x3xf32> to vector<8x3xf32>
    %122 = vector.extract_strided_slice %121 {offsets = [0, 0], sizes = [8, 1], strides = [1, 1]} : vector<8x3xf32> to vector<8x1xf32>
    %123 = vector.broadcast %122 : vector<8x1xf32> to vector<8x16xf32>
    %124 = arith.mulf %119, %123 : vector<8x16xf32>
    %125 = vector.extract_strided_slice %121 {offsets = [0, 1], sizes = [8, 1], strides = [1, 1]} : vector<8x3xf32> to vector<8x1xf32>
    %126 = vector.broadcast %125 : vector<8x1xf32> to vector<8x16xf32>
    %127 = arith.mulf %118, %126 : vector<8x16xf32>
    %128 = arith.addf %124, %127 : vector<8x16xf32>
    %129 = vector.extract_strided_slice %121 {offsets = [0, 2], sizes = [8, 1], strides = [1, 1]} : vector<8x3xf32> to vector<8x1xf32>
    %130 = vector.broadcast %129 : vector<8x1xf32> to vector<8x16xf32>
    %131 = arith.mulf %120, %130 : vector<8x16xf32>
    %132 = arith.addf %128, %131 : vector<8x16xf32>
    %133 = vector.extract_strided_slice %37 {offsets = [8, 0], sizes = [8, 1], strides = [1, 1]} : vector<64x1xf32> to vector<8x1xf32>
    %cst_33 = arith.constant 1.000000e-30 : f32
    %134 = vector.broadcast %cst_33 : f32 to vector<8x16xf32>
    %135 = arith.maximumf %132, %134 : vector<8x16xf32>
    %136 = math.log %135 : vector<8x16xf32>
    %137 = vector.broadcast %133 : vector<8x1xf32> to vector<8x16xf32>
    %138 = arith.mulf %137, %136 : vector<8x16xf32>
    %139 = math.exp %138 : vector<8x16xf32>
    %cst_34 = arith.constant dense<0.000000e+00> : vector<8xf32>
    %140 = vector.multi_reduction <add>, %139, %cst_34 [1] : vector<8x16xf32> to vector<8xf32>
    %141 = vector.shape_cast %140 : vector<8xf32> to vector<8x1xf32>
    %cst_35 = arith.constant 1.000000e-16 : f32
    %142 = vector.broadcast %cst_35 : f32 to vector<8x1xf32>
    %143 = arith.addf %141, %142 : vector<8x1xf32>
    %144 = vector.broadcast %143 : vector<8x1xf32> to vector<8x16xf32>
    %145 = arith.divf %139, %144 : vector<8x16xf32>
    %146 = vector.extract_strided_slice %23 {offsets = [16, 0], sizes = [8, 1], strides = [1, 1]} : vector<64x1xf32> to vector<8x1xf32>
    %147 = vector.extract_strided_slice %72 {offsets = [16, 0], sizes = [8, 16], strides = [1, 1]} : vector<64x16xf32> to vector<8x16xf32>
    %148 = vector.broadcast %146 : vector<8x1xf32> to vector<8x16xf32>
    %149 = arith.mulf %148, %147 : vector<8x16xf32>
    %cst_36 = arith.constant 1.000000e+00 : f32
    %150 = vector.broadcast %cst_36 : f32 to vector<8x1xf32>
    %151 = arith.subf %150, %146 : vector<8x1xf32>
    %152 = vector.broadcast %151 : vector<8x1xf32> to vector<8x16xf32>
    %153 = arith.mulf %152, %145 : vector<8x16xf32>
    %154 = arith.addf %149, %153 : vector<8x16xf32>
    %c1_i32_37 = arith.constant 1 : i32
    %155 = tpu.dynamic_rotate %154 by %c1_i32_37 dim 1 : vector<8x16xf32>, i32 -> vector<8x16xf32>
    %c15_i32_38 = arith.constant 15 : i32
    %156 = tpu.dynamic_rotate %154 by %c15_i32_38 dim 1 : vector<8x16xf32>, i32 -> vector<8x16xf32>
    %157 = vector.extract_strided_slice %47 {offsets = [16, 0], sizes = [8, 3], strides = [1, 1]} : vector<64x3xf32> to vector<8x3xf32>
    %158 = vector.extract_strided_slice %157 {offsets = [0, 0], sizes = [8, 1], strides = [1, 1]} : vector<8x3xf32> to vector<8x1xf32>
    %159 = vector.broadcast %158 : vector<8x1xf32> to vector<8x16xf32>
    %160 = arith.mulf %155, %159 : vector<8x16xf32>
    %161 = vector.extract_strided_slice %157 {offsets = [0, 1], sizes = [8, 1], strides = [1, 1]} : vector<8x3xf32> to vector<8x1xf32>
    %162 = vector.broadcast %161 : vector<8x1xf32> to vector<8x16xf32>
    %163 = arith.mulf %154, %162 : vector<8x16xf32>
    %164 = arith.addf %160, %163 : vector<8x16xf32>
    %165 = vector.extract_strided_slice %157 {offsets = [0, 2], sizes = [8, 1], strides = [1, 1]} : vector<8x3xf32> to vector<8x1xf32>
    %166 = vector.broadcast %165 : vector<8x1xf32> to vector<8x16xf32>
    %167 = arith.mulf %156, %166 : vector<8x16xf32>
    %168 = arith.addf %164, %167 : vector<8x16xf32>
    %169 = vector.extract_strided_slice %37 {offsets = [16, 0], sizes = [8, 1], strides = [1, 1]} : vector<64x1xf32> to vector<8x1xf32>
    %cst_39 = arith.constant 1.000000e-30 : f32
    %170 = vector.broadcast %cst_39 : f32 to vector<8x16xf32>
    %171 = arith.maximumf %168, %170 : vector<8x16xf32>
    %172 = math.log %171 : vector<8x16xf32>
    %173 = vector.broadcast %169 : vector<8x1xf32> to vector<8x16xf32>
    %174 = arith.mulf %173, %172 : vector<8x16xf32>
    %175 = math.exp %174 : vector<8x16xf32>
    %cst_40 = arith.constant dense<0.000000e+00> : vector<8xf32>
    %176 = vector.multi_reduction <add>, %175, %cst_40 [1] : vector<8x16xf32> to vector<8xf32>
    %177 = vector.shape_cast %176 : vector<8xf32> to vector<8x1xf32>
    %cst_41 = arith.constant 1.000000e-16 : f32
    %178 = vector.broadcast %cst_41 : f32 to vector<8x1xf32>
    %179 = arith.addf %177, %178 : vector<8x1xf32>
    %180 = vector.broadcast %179 : vector<8x1xf32> to vector<8x16xf32>
    %181 = arith.divf %175, %180 : vector<8x16xf32>
    %182 = vector.extract_strided_slice %23 {offsets = [24, 0], sizes = [8, 1], strides = [1, 1]} : vector<64x1xf32> to vector<8x1xf32>
    %183 = vector.extract_strided_slice %72 {offsets = [24, 0], sizes = [8, 16], strides = [1, 1]} : vector<64x16xf32> to vector<8x16xf32>
    %184 = vector.broadcast %182 : vector<8x1xf32> to vector<8x16xf32>
    %185 = arith.mulf %184, %183 : vector<8x16xf32>
    %cst_42 = arith.constant 1.000000e+00 : f32
    %186 = vector.broadcast %cst_42 : f32 to vector<8x1xf32>
    %187 = arith.subf %186, %182 : vector<8x1xf32>
    %188 = vector.broadcast %187 : vector<8x1xf32> to vector<8x16xf32>
    %189 = arith.mulf %188, %181 : vector<8x16xf32>
    %190 = arith.addf %185, %189 : vector<8x16xf32>
    %c1_i32_43 = arith.constant 1 : i32
    %191 = tpu.dynamic_rotate %190 by %c1_i32_43 dim 1 : vector<8x16xf32>, i32 -> vector<8x16xf32>
    %c15_i32_44 = arith.constant 15 : i32
    %192 = tpu.dynamic_rotate %190 by %c15_i32_44 dim 1 : vector<8x16xf32>, i32 -> vector<8x16xf32>
    %193 = vector.extract_strided_slice %47 {offsets = [24, 0], sizes = [8, 3], strides = [1, 1]} : vector<64x3xf32> to vector<8x3xf32>
    %194 = vector.extract_strided_slice %193 {offsets = [0, 0], sizes = [8, 1], strides = [1, 1]} : vector<8x3xf32> to vector<8x1xf32>
    %195 = vector.broadcast %194 : vector<8x1xf32> to vector<8x16xf32>
    %196 = arith.mulf %191, %195 : vector<8x16xf32>
    %197 = vector.extract_strided_slice %193 {offsets = [0, 1], sizes = [8, 1], strides = [1, 1]} : vector<8x3xf32> to vector<8x1xf32>
    %198 = vector.broadcast %197 : vector<8x1xf32> to vector<8x16xf32>
    %199 = arith.mulf %190, %198 : vector<8x16xf32>
    %200 = arith.addf %196, %199 : vector<8x16xf32>
    %201 = vector.extract_strided_slice %193 {offsets = [0, 2], sizes = [8, 1], strides = [1, 1]} : vector<8x3xf32> to vector<8x1xf32>
    %202 = vector.broadcast %201 : vector<8x1xf32> to vector<8x16xf32>
    %203 = arith.mulf %192, %202 : vector<8x16xf32>
    %204 = arith.addf %200, %203 : vector<8x16xf32>
    %205 = vector.extract_strided_slice %37 {offsets = [24, 0], sizes = [8, 1], strides = [1, 1]} : vector<64x1xf32> to vector<8x1xf32>
    %cst_45 = arith.constant 1.000000e-30 : f32
    %206 = vector.broadcast %cst_45 : f32 to vector<8x16xf32>
    %207 = arith.maximumf %204, %206 : vector<8x16xf32>
    %208 = math.log %207 : vector<8x16xf32>
    %209 = vector.broadcast %205 : vector<8x1xf32> to vector<8x16xf32>
    %210 = arith.mulf %209, %208 : vector<8x16xf32>
    %211 = math.exp %210 : vector<8x16xf32>
    %cst_46 = arith.constant dense<0.000000e+00> : vector<8xf32>
    %212 = vector.multi_reduction <add>, %211, %cst_46 [1] : vector<8x16xf32> to vector<8xf32>
    %213 = vector.shape_cast %212 : vector<8xf32> to vector<8x1xf32>
    %cst_47 = arith.constant 1.000000e-16 : f32
    %214 = vector.broadcast %cst_47 : f32 to vector<8x1xf32>
    %215 = arith.addf %213, %214 : vector<8x1xf32>
    %216 = vector.broadcast %215 : vector<8x1xf32> to vector<8x16xf32>
    %217 = arith.divf %211, %216 : vector<8x16xf32>
    %218 = vector.extract_strided_slice %23 {offsets = [32, 0], sizes = [8, 1], strides = [1, 1]} : vector<64x1xf32> to vector<8x1xf32>
    %219 = vector.extract_strided_slice %72 {offsets = [32, 0], sizes = [8, 16], strides = [1, 1]} : vector<64x16xf32> to vector<8x16xf32>
    %220 = vector.broadcast %218 : vector<8x1xf32> to vector<8x16xf32>
    %221 = arith.mulf %220, %219 : vector<8x16xf32>
    %cst_48 = arith.constant 1.000000e+00 : f32
    %222 = vector.broadcast %cst_48 : f32 to vector<8x1xf32>
    %223 = arith.subf %222, %218 : vector<8x1xf32>
    %224 = vector.broadcast %223 : vector<8x1xf32> to vector<8x16xf32>
    %225 = arith.mulf %224, %217 : vector<8x16xf32>
    %226 = arith.addf %221, %225 : vector<8x16xf32>
    %c1_i32_49 = arith.constant 1 : i32
    %227 = tpu.dynamic_rotate %226 by %c1_i32_49 dim 1 : vector<8x16xf32>, i32 -> vector<8x16xf32>
    %c15_i32_50 = arith.constant 15 : i32
    %228 = tpu.dynamic_rotate %226 by %c15_i32_50 dim 1 : vector<8x16xf32>, i32 -> vector<8x16xf32>
    %229 = vector.extract_strided_slice %47 {offsets = [32, 0], sizes = [8, 3], strides = [1, 1]} : vector<64x3xf32> to vector<8x3xf32>
    %230 = vector.extract_strided_slice %229 {offsets = [0, 0], sizes = [8, 1], strides = [1, 1]} : vector<8x3xf32> to vector<8x1xf32>
    %231 = vector.broadcast %230 : vector<8x1xf32> to vector<8x16xf32>
    %232 = arith.mulf %227, %231 : vector<8x16xf32>
    %233 = vector.extract_strided_slice %229 {offsets = [0, 1], sizes = [8, 1], strides = [1, 1]} : vector<8x3xf32> to vector<8x1xf32>
    %234 = vector.broadcast %233 : vector<8x1xf32> to vector<8x16xf32>
    %235 = arith.mulf %226, %234 : vector<8x16xf32>
    %236 = arith.addf %232, %235 : vector<8x16xf32>
    %237 = vector.extract_strided_slice %229 {offsets = [0, 2], sizes = [8, 1], strides = [1, 1]} : vector<8x3xf32> to vector<8x1xf32>
    %238 = vector.broadcast %237 : vector<8x1xf32> to vector<8x16xf32>
    %239 = arith.mulf %228, %238 : vector<8x16xf32>
    %240 = arith.addf %236, %239 : vector<8x16xf32>
    %241 = vector.extract_strided_slice %37 {offsets = [32, 0], sizes = [8, 1], strides = [1, 1]} : vector<64x1xf32> to vector<8x1xf32>
    %cst_51 = arith.constant 1.000000e-30 : f32
    %242 = vector.broadcast %cst_51 : f32 to vector<8x16xf32>
    %243 = arith.maximumf %240, %242 : vector<8x16xf32>
    %244 = math.log %243 : vector<8x16xf32>
    %245 = vector.broadcast %241 : vector<8x1xf32> to vector<8x16xf32>
    %246 = arith.mulf %245, %244 : vector<8x16xf32>
    %247 = math.exp %246 : vector<8x16xf32>
    %cst_52 = arith.constant dense<0.000000e+00> : vector<8xf32>
    %248 = vector.multi_reduction <add>, %247, %cst_52 [1] : vector<8x16xf32> to vector<8xf32>
    %249 = vector.shape_cast %248 : vector<8xf32> to vector<8x1xf32>
    %cst_53 = arith.constant 1.000000e-16 : f32
    %250 = vector.broadcast %cst_53 : f32 to vector<8x1xf32>
    %251 = arith.addf %249, %250 : vector<8x1xf32>
    %252 = vector.broadcast %251 : vector<8x1xf32> to vector<8x16xf32>
    %253 = arith.divf %247, %252 : vector<8x16xf32>
    %254 = vector.extract_strided_slice %23 {offsets = [40, 0], sizes = [8, 1], strides = [1, 1]} : vector<64x1xf32> to vector<8x1xf32>
    %255 = vector.extract_strided_slice %72 {offsets = [40, 0], sizes = [8, 16], strides = [1, 1]} : vector<64x16xf32> to vector<8x16xf32>
    %256 = vector.broadcast %254 : vector<8x1xf32> to vector<8x16xf32>
    %257 = arith.mulf %256, %255 : vector<8x16xf32>
    %cst_54 = arith.constant 1.000000e+00 : f32
    %258 = vector.broadcast %cst_54 : f32 to vector<8x1xf32>
    %259 = arith.subf %258, %254 : vector<8x1xf32>
    %260 = vector.broadcast %259 : vector<8x1xf32> to vector<8x16xf32>
    %261 = arith.mulf %260, %253 : vector<8x16xf32>
    %262 = arith.addf %257, %261 : vector<8x16xf32>
    %c1_i32_55 = arith.constant 1 : i32
    %263 = tpu.dynamic_rotate %262 by %c1_i32_55 dim 1 : vector<8x16xf32>, i32 -> vector<8x16xf32>
    %c15_i32_56 = arith.constant 15 : i32
    %264 = tpu.dynamic_rotate %262 by %c15_i32_56 dim 1 : vector<8x16xf32>, i32 -> vector<8x16xf32>
    %265 = vector.extract_strided_slice %47 {offsets = [40, 0], sizes = [8, 3], strides = [1, 1]} : vector<64x3xf32> to vector<8x3xf32>
    %266 = vector.extract_strided_slice %265 {offsets = [0, 0], sizes = [8, 1], strides = [1, 1]} : vector<8x3xf32> to vector<8x1xf32>
    %267 = vector.broadcast %266 : vector<8x1xf32> to vector<8x16xf32>
    %268 = arith.mulf %263, %267 : vector<8x16xf32>
    %269 = vector.extract_strided_slice %265 {offsets = [0, 1], sizes = [8, 1], strides = [1, 1]} : vector<8x3xf32> to vector<8x1xf32>
    %270 = vector.broadcast %269 : vector<8x1xf32> to vector<8x16xf32>
    %271 = arith.mulf %262, %270 : vector<8x16xf32>
    %272 = arith.addf %268, %271 : vector<8x16xf32>
    %273 = vector.extract_strided_slice %265 {offsets = [0, 2], sizes = [8, 1], strides = [1, 1]} : vector<8x3xf32> to vector<8x1xf32>
    %274 = vector.broadcast %273 : vector<8x1xf32> to vector<8x16xf32>
    %275 = arith.mulf %264, %274 : vector<8x16xf32>
    %276 = arith.addf %272, %275 : vector<8x16xf32>
    %277 = vector.extract_strided_slice %37 {offsets = [40, 0], sizes = [8, 1], strides = [1, 1]} : vector<64x1xf32> to vector<8x1xf32>
    %cst_57 = arith.constant 1.000000e-30 : f32
    %278 = vector.broadcast %cst_57 : f32 to vector<8x16xf32>
    %279 = arith.maximumf %276, %278 : vector<8x16xf32>
    %280 = math.log %279 : vector<8x16xf32>
    %281 = vector.broadcast %277 : vector<8x1xf32> to vector<8x16xf32>
    %282 = arith.mulf %281, %280 : vector<8x16xf32>
    %283 = math.exp %282 : vector<8x16xf32>
    %cst_58 = arith.constant dense<0.000000e+00> : vector<8xf32>
    %284 = vector.multi_reduction <add>, %283, %cst_58 [1] : vector<8x16xf32> to vector<8xf32>
    %285 = vector.shape_cast %284 : vector<8xf32> to vector<8x1xf32>
    %cst_59 = arith.constant 1.000000e-16 : f32
    %286 = vector.broadcast %cst_59 : f32 to vector<8x1xf32>
    %287 = arith.addf %285, %286 : vector<8x1xf32>
    %288 = vector.broadcast %287 : vector<8x1xf32> to vector<8x16xf32>
    %289 = arith.divf %283, %288 : vector<8x16xf32>
    %290 = vector.extract_strided_slice %23 {offsets = [48, 0], sizes = [8, 1], strides = [1, 1]} : vector<64x1xf32> to vector<8x1xf32>
    %291 = vector.extract_strided_slice %72 {offsets = [48, 0], sizes = [8, 16], strides = [1, 1]} : vector<64x16xf32> to vector<8x16xf32>
    %292 = vector.broadcast %290 : vector<8x1xf32> to vector<8x16xf32>
    %293 = arith.mulf %292, %291 : vector<8x16xf32>
    %cst_60 = arith.constant 1.000000e+00 : f32
    %294 = vector.broadcast %cst_60 : f32 to vector<8x1xf32>
    %295 = arith.subf %294, %290 : vector<8x1xf32>
    %296 = vector.broadcast %295 : vector<8x1xf32> to vector<8x16xf32>
    %297 = arith.mulf %296, %289 : vector<8x16xf32>
    %298 = arith.addf %293, %297 : vector<8x16xf32>
    %c1_i32_61 = arith.constant 1 : i32
    %299 = tpu.dynamic_rotate %298 by %c1_i32_61 dim 1 : vector<8x16xf32>, i32 -> vector<8x16xf32>
    %c15_i32_62 = arith.constant 15 : i32
    %300 = tpu.dynamic_rotate %298 by %c15_i32_62 dim 1 : vector<8x16xf32>, i32 -> vector<8x16xf32>
    %301 = vector.extract_strided_slice %47 {offsets = [48, 0], sizes = [8, 3], strides = [1, 1]} : vector<64x3xf32> to vector<8x3xf32>
    %302 = vector.extract_strided_slice %301 {offsets = [0, 0], sizes = [8, 1], strides = [1, 1]} : vector<8x3xf32> to vector<8x1xf32>
    %303 = vector.broadcast %302 : vector<8x1xf32> to vector<8x16xf32>
    %304 = arith.mulf %299, %303 : vector<8x16xf32>
    %305 = vector.extract_strided_slice %301 {offsets = [0, 1], sizes = [8, 1], strides = [1, 1]} : vector<8x3xf32> to vector<8x1xf32>
    %306 = vector.broadcast %305 : vector<8x1xf32> to vector<8x16xf32>
    %307 = arith.mulf %298, %306 : vector<8x16xf32>
    %308 = arith.addf %304, %307 : vector<8x16xf32>
    %309 = vector.extract_strided_slice %301 {offsets = [0, 2], sizes = [8, 1], strides = [1, 1]} : vector<8x3xf32> to vector<8x1xf32>
    %310 = vector.broadcast %309 : vector<8x1xf32> to vector<8x16xf32>
    %311 = arith.mulf %300, %310 : vector<8x16xf32>
    %312 = arith.addf %308, %311 : vector<8x16xf32>
    %313 = vector.extract_strided_slice %37 {offsets = [48, 0], sizes = [8, 1], strides = [1, 1]} : vector<64x1xf32> to vector<8x1xf32>
    %cst_63 = arith.constant 1.000000e-30 : f32
    %314 = vector.broadcast %cst_63 : f32 to vector<8x16xf32>
    %315 = arith.maximumf %312, %314 : vector<8x16xf32>
    %316 = math.log %315 : vector<8x16xf32>
    %317 = vector.broadcast %313 : vector<8x1xf32> to vector<8x16xf32>
    %318 = arith.mulf %317, %316 : vector<8x16xf32>
    %319 = math.exp %318 : vector<8x16xf32>
    %cst_64 = arith.constant dense<0.000000e+00> : vector<8xf32>
    %320 = vector.multi_reduction <add>, %319, %cst_64 [1] : vector<8x16xf32> to vector<8xf32>
    %321 = vector.shape_cast %320 : vector<8xf32> to vector<8x1xf32>
    %cst_65 = arith.constant 1.000000e-16 : f32
    %322 = vector.broadcast %cst_65 : f32 to vector<8x1xf32>
    %323 = arith.addf %321, %322 : vector<8x1xf32>
    %324 = vector.broadcast %323 : vector<8x1xf32> to vector<8x16xf32>
    %325 = arith.divf %319, %324 : vector<8x16xf32>
    %326 = vector.extract_strided_slice %23 {offsets = [56, 0], sizes = [8, 1], strides = [1, 1]} : vector<64x1xf32> to vector<8x1xf32>
    %327 = vector.extract_strided_slice %72 {offsets = [56, 0], sizes = [8, 16], strides = [1, 1]} : vector<64x16xf32> to vector<8x16xf32>
    %328 = vector.broadcast %326 : vector<8x1xf32> to vector<8x16xf32>
    %329 = arith.mulf %328, %327 : vector<8x16xf32>
    %cst_66 = arith.constant 1.000000e+00 : f32
    %330 = vector.broadcast %cst_66 : f32 to vector<8x1xf32>
    %331 = arith.subf %330, %326 : vector<8x1xf32>
    %332 = vector.broadcast %331 : vector<8x1xf32> to vector<8x16xf32>
    %333 = arith.mulf %332, %325 : vector<8x16xf32>
    %334 = arith.addf %329, %333 : vector<8x16xf32>
    %c1_i32_67 = arith.constant 1 : i32
    %335 = tpu.dynamic_rotate %334 by %c1_i32_67 dim 1 : vector<8x16xf32>, i32 -> vector<8x16xf32>
    %c15_i32_68 = arith.constant 15 : i32
    %336 = tpu.dynamic_rotate %334 by %c15_i32_68 dim 1 : vector<8x16xf32>, i32 -> vector<8x16xf32>
    %337 = vector.extract_strided_slice %47 {offsets = [56, 0], sizes = [8, 3], strides = [1, 1]} : vector<64x3xf32> to vector<8x3xf32>
    %338 = vector.extract_strided_slice %337 {offsets = [0, 0], sizes = [8, 1], strides = [1, 1]} : vector<8x3xf32> to vector<8x1xf32>
    %339 = vector.broadcast %338 : vector<8x1xf32> to vector<8x16xf32>
    %340 = arith.mulf %335, %339 : vector<8x16xf32>
    %341 = vector.extract_strided_slice %337 {offsets = [0, 1], sizes = [8, 1], strides = [1, 1]} : vector<8x3xf32> to vector<8x1xf32>
    %342 = vector.broadcast %341 : vector<8x1xf32> to vector<8x16xf32>
    %343 = arith.mulf %334, %342 : vector<8x16xf32>
    %344 = arith.addf %340, %343 : vector<8x16xf32>
    %345 = vector.extract_strided_slice %337 {offsets = [0, 2], sizes = [8, 1], strides = [1, 1]} : vector<8x3xf32> to vector<8x1xf32>
    %346 = vector.broadcast %345 : vector<8x1xf32> to vector<8x16xf32>
    %347 = arith.mulf %336, %346 : vector<8x16xf32>
    %348 = arith.addf %344, %347 : vector<8x16xf32>
    %349 = vector.extract_strided_slice %37 {offsets = [56, 0], sizes = [8, 1], strides = [1, 1]} : vector<64x1xf32> to vector<8x1xf32>
    %cst_69 = arith.constant 1.000000e-30 : f32
    %350 = vector.broadcast %cst_69 : f32 to vector<8x16xf32>
    %351 = arith.maximumf %348, %350 : vector<8x16xf32>
    %352 = math.log %351 : vector<8x16xf32>
    %353 = vector.broadcast %349 : vector<8x1xf32> to vector<8x16xf32>
    %354 = arith.mulf %353, %352 : vector<8x16xf32>
    %355 = math.exp %354 : vector<8x16xf32>
    %cst_70 = arith.constant dense<0.000000e+00> : vector<8xf32>
    %356 = vector.multi_reduction <add>, %355, %cst_70 [1] : vector<8x16xf32> to vector<8xf32>
    %357 = vector.shape_cast %356 : vector<8xf32> to vector<8x1xf32>
    %cst_71 = arith.constant 1.000000e-16 : f32
    %358 = vector.broadcast %cst_71 : f32 to vector<8x1xf32>
    %359 = arith.addf %357, %358 : vector<8x1xf32>
    %360 = vector.broadcast %359 : vector<8x1xf32> to vector<8x16xf32>
    %361 = arith.divf %355, %360 : vector<8x16xf32>
    %362 = tpu.concatenate %109, %145, %181, %217, %253, %289, %325, %361 in 0 : vector<8x16xf32>, vector<8x16xf32>, vector<8x16xf32>, vector<8x16xf32>, vector<8x16xf32>, vector<8x16xf32>, vector<8x16xf32>, vector<8x16xf32> -> vector<64x16xf32>
    %c0_72 = arith.constant 0 : index
    %c0_73 = arith.constant 0 : index
    %363 = vector.load %arg7[%c0_72, %c0_73] : memref<64x16xf32, #tpu.memory_space<vmem>>, vector<64x16xf32>
    tpu.vector_store %arg7[%c0_72, %c0_73], %362 {strides = array<i32>} : memref<64x16xf32, #tpu.memory_space<vmem>>, vector<64x16xf32>,
    %cst_74 = arith.constant dense<0.000000e+00> : vector<64x8xf32>
    %364 = tpu.matmul %362, %48, %cst_74 {dimension_numbers = #tpu.dot_dimension_numbers<[1], [0], [0], [1], [0, 0, 1, 1], [], []>} : vector<64x16xf32>, vector<16x8xf32>, vector<64x8xf32> -> vector<64x8xf32>
    %c0_75 = arith.constant 0 : index
    %c0_76 = arith.constant 0 : index
    %365 = vector.load %arg6[%c0_75, %c0_76] : memref<64x8xf32, #tpu.memory_space<vmem>>, vector<64x8xf32>
    tpu.vector_store %arg6[%c0_75, %c0_76], %364 {strides = array<i32>} : memref<64x8xf32, #tpu.memory_space<vmem>>, vector<64x8xf32>,
    return
  }
}

</mosaic_0001>

<bundles_post_ra>
// kernel: ntm_read_head_forward_seq.1
= control target key start
LH: loop header
LB: loop body
LE: loop exit
PB: predicated region body
PF: predicated region fallthrough
CT: control target
= control target key end

     0   :  { %vm463_vm0 = vcmask 64512   ;;  %vm41_vm1 = vcmask 261120   ;;  %v1900_v7 = vmov 8   ;;  %v1901_v24 = vmov 9   ;;  %s1902_s18 = smov 118   ;;  %s1903_s21 = smov 16   ;;  %s2445_s1 = inlined_call_operand.vmem [shape: f32[32,14], index: 1, kind: input, shape index: {}]   ;;  %s2446_s3 = inlined_call_operand.vmem [shape: f32[16,8], index: 3, kind: input, shape index: {}]   ;;  %s2447_s2 = inlined_call_operand.vmem [shape: f32[1,14], index: 2, kind: input, shape index: {}]   ;;  %s2448_s0 = inlined_call_operand.vmem [shape: f32[64,32], index: 0, kind: input, shape index: {}]   ;;  %s2449_s4 = inlined_call_operand.vmem [shape: f32[1,16], index: 4, kind: input, shape index: {}]   ;;  %s2450_s5 = inlined_call_operand.vmem [shape: f32[8,16], index: 5, kind: input, shape index: {}]   ;;  %s2451_s7 = inlined_call_operand.vmem [shape: f32[64,16], index: 7, kind: output, shape index: {1}]   ;;  %s2452_s6 = inlined_call_operand.vmem [shape: f32[64,8], index: 6, kind: output, shape index: {0}]  }
   0x1   :  { %v36_v0 = vld [vmem:[%s2445_s1 + $0x18] sm:$0xff]  ;;  %v35_v1 = vld [vmem:[%s2445_s1 + $0x10] sm:$0xff]  ;;  %v462_v2 = vld [vmem:[%s2446_s3 + $0x8] sm:$0xff]  ;;  %1648 = vset.pattern.permute.xlu0 %v1900_v7  ;;  %1649 = vset.pattern.permute.xlu1 %v1901_v24  ;;  %vm723_vm5 = vcmask 130048   ;;  %vm339_vm6 = vcmask 105552   ;;  %vm420_vm11 = vcmask 23552  }
   0x2   :  { %78 = vmatpush.msra.mxu0 %v36_v0  ;;  %1629 = vmatpush.msra.mxu3 %v36_v0  ;;  %v34_v3 = vld [vmem:[%s2445_s1 + $0x8] sm:$0xff]  ;;  %v33_v4 = vld [vmem:[%s2445_s1] sm:$0xff]  ;;  %vm827_vm12 = vcmask 1047680   ;;  %s1908_s23 = smov 15   ;;  %s1909_s24 = smov 14  }
   0x3   :  { %1611 = vmatpush.xpose.msk.msra.mxu1 %vm463_vm0, %v462_v2  ;;  %1552 = vmatpush.msra.mxu2 %v462_v2  ;;  %v25_v5 = vld [vmem:[%s2448_s0] sm:$0xff]  ;;  %s1910_s25 = smov 113  }
   0x4   :  { %79 = vmatpush.msra.mxu0 %v35_v1  ;;  %1630 = vmatpush.msra.mxu3 %v35_v1  ;;  %v461_v6 = vld [vmem:[%s2446_s3] sm:$0xff] }
   0x5   :  { %1553 = vmatpush.msra.mxu2 %v461_v6  ;;  %v1981_v8 = vld [vmem:[%s2447_s2] ss:$0 sm:$0xff]  ;;  %1650 = vset.pattern.permute.xlu2 %v1901_v24 }
   0x6   :  { %80 = vmatpush.msra.mxu0 %v34_v3  ;;  %1631 = vmatpush.msra.mxu3 %v34_v3  ;;  %v2002_v32 = vld [vmem:[%s2449_s4] ss:$0 sm:$0xff] }
   0x7   :  { %1612 = vmatpush.xpose.msk.msra.mxu1 %vm463_vm0, %v461_v6 }
   0x8   :  { %81 = vmatpush.msra.mxu0 %v33_v4  ;;  %1632 = vmatpush.msra.mxu3 %v33_v4 }
   0x9   :  { %1595 = vmatmul.msk.f32.vlgmr.msra.gmra.mxu0 %vm41_vm1, %v25_v5 }
   0xa   :  { %1633 = vmatpush.xpose.msk.msrb.mxu3 %vm463_vm0, %v462_v2  ;;  %v812_v2 = vld [vmem:[%s2450_s5] sm:$0xff] }
   0xe   :  { %1634 = vmatpush.xpose.msk.msrb.mxu3 %vm463_vm0, %v461_v6 }
  0x86   :  { %v83_v9 = vpop.f32.mrf.mxu0 }
  0x87   :  { %v1984_v10 = vadd.f32 %v1981_v8, %v83_v9 }
  0x89   :  { %1613 = vmatmul.msk.f32.vlgmr.msra.gmra.mxu1 %vm463_vm0, %v1984_v10  ;;  %v535_v11 = vmul.f32 %v1984_v10, %v1984_v10  ;;  %v115_v12 = vand.u32 2147483647, %v1984_v10  ;;  %v107_v19 = vmax.f32 %v1984_v10, 0.0  ;;  %v1603_v29 = vmul.f32 -1.442695, %v1984_v10 }
  0x8a   :  { %v340_v42 = vsel %vm339_vm6, %v1984_v10, -inf }
  0x8b   :  { %v543_v13 = vsel %vm463_vm0, %v535_v11, 0.0  ;;  %v123_v14 = vsub.f32 0.0, %v115_v12  ;;  %v1904_v12 = vmov 11  }
  0x8c   :  { %544 = vadd.xlane.f32.xlu0 %v543_v13 }
  0x8d   :  { %v131_v15 = vmul.f32 1.442695, %v123_v14 }
  0x8f   :  { %1704 = vpow2.f32 %v131_v15 }
  0x95   :  { %v1705_v16 = vpop.eup %1704 }
  0x96   :  { %v147_v17 = vadd.f32 1.0, %v1705_v16  ;;  %v1905_v16 = vmov 10  }
  0x98   :  { %1706 = vlog2.f32 %v147_v17 }
  0x9e   :  { %v1707_v18 = vpop.eup %1706 }
  0x9f   :  { %v156_v20 = vmul.f32 0.6931472, %v1707_v18  ;;  %v1906_v18 = vmov 13  }
  0xa1   :  { %v1993_v21 = vadd.f32 %v156_v20, %v107_v19  ;;  %v1907_v19 = vmov 12   ;;  %v26_v20 = vld [vmem:[%s2448_s0 + $0x8] sm:$0xff] }
  0xa2   :  { %1596 = vmatmul.msk.f32.gmra.mxu0 %vm41_vm1, %v26_v20 }
  0xa3   :  { %677 = vperm.xlu0 %1648, %v1993_v21   ;;  %v331_v17 = vadd.f32 1.0, %v1993_v21 }
  0xab   :  { %1651 = vset.pattern.permute.xlu0 %v1904_v12 }
  0xff   :  { %v545_v22 = vpop.xlane.xlu0 %544 }
 0x100   :  { %v567_v23 = vmax.f32 %v545_v22, 1e-16 }
 0x102   :  { %1708 = vrsqrt.f32 %v567_v23  ;;  %vm581_vm3 = vweird.f32 %v567_v23 }
 0x103   :  { %1710 = vpow2.f32 %v1603_v29 }
 0x106   :  { %v511_v33 = vpop.f32.mrf.mxu1 }
 0x108   :  { %v1709_v25 = vpop.eup %1708 }
 0x109   :  { %v576_v26 = vmul.f32 %v1709_v25, %v567_v23  ;;  %vm582_vm2 = vweird.f32 %v1709_v25  ;;  %v1711_v38 = vpop.eup %1710 }
 0x10a   :  { %vm583_vm4 = vmor %vm581_vm3, %vm582_vm2  ;;  %v203_v41 = vadd.f32 1.0, %v1711_v38 }
 0x10b   :  { %v577_v27 = vmul.f32 %v1709_v25, %v576_v26 }
 0x10c   :  { %1712 = vrcp.f32 %v203_v41  ;;  %v222_v48 = vand.u32 2147483648, %v203_v41  ;;  %vm216_vm8 = vweird.f32 %v203_v41  ;;  %v220_v49 = vand.u32 2147483647, %v203_v41 }
 0x10d   :  { %v578_v28 = vmul.f32 0.5, %v577_v27 }
 0x10e   :  { %v223_v51 = vor.u32 1.1754944e-38, %v222_v48  ;;  %vm221_vm10 = vcmp.eq.f32.partialorder %v220_v49, 8.507059e+37 }
 0x10f   :  { %v579_v30 = vsub.f32 1.5, %v578_v28 }
 0x111   :  { %v580_v31 = vmul.f32 %v1709_v25, %v579_v30 }
 0x112   :  { %v1713_v43 = vpop.eup %1712 }
 0x113   :  { %v584_v34 = vsel %vm583_vm4, %v1709_v25, %v580_v31  ;;  %v212_v44 = vmul.f32 %v1713_v43, %v203_v41  ;;  %vm217_vm7 = vweird.f32 %v1713_v43 }
 0x114   :  { %v655_v35 = vmul.f32 %v584_v34, %v511_v33  ;;  %vm218_vm9 = vmor %vm216_vm8, %vm217_vm7 }
 0x115   :  { %v678_v37 = vpop.permute.xlu0 %677  ;;  %v213_v45 = vsub.f32 1.0, %v212_v44 }
 0x116   :  { %v667_v36 = vmul.f32 %v2002_v32, %v655_v35 }
 0x117   :  { %v214_v46 = vmul.f32 %v1713_v43, %v213_v45 }
 0x118   :  { %v715_v39 = vmul.f32 %v678_v37, %v667_v36 }
 0x119   :  { %v215_v47 = vadd.f32 %v1713_v43, %v214_v46 }
 0x11a   :  { %v724_v40 = vsel %vm723_vm5, %v715_v39, -inf }
 0x11b   :  { %725 = vmax.xlane.f32.xlu1 %v724_v40  ;;  %v219_v50 = vsel %vm218_vm9, %v1713_v43, %v215_v47 }
 0x11c   :  { %v224_v52 = vsel %vm221_vm10, %v223_v51, %v219_v50 }
 0x11d   :  { %v819_v62 = vsub.f32 1.0, %v224_v52 }
 0x11f   :  { %v86_v26 = vpop.f32.mrf.mxu0 }
 0x120   :  { %v2032_v27 = vadd.f32 %v1981_v8, %v86_v26 }
 0x122   :  { %1614 = vmatmul.msk.f32.gmra.mxu1 %vm463_vm0, %v2032_v27  ;;  %v116_v33 = vand.u32 2147483647, %v2032_v27  ;;  %v536_v38 = vmul.f32 %v2032_v27, %v2032_v27  ;;  %v108_v40 = vmax.f32 %v2032_v27, 0.0  ;;  %v343_v44 = vsel %vm339_vm6, %v2032_v27, -inf }
 0x123   :  { %341 = vmax.xlane.f32.xlu1 %v340_v42  ;;  %v1604_v45 = vmul.f32 -1.442695, %v2032_v27 }
 0x124   :  { %v124_v34 = vsub.f32 0.0, %v116_v33 }
 0x126   :  { %v133_v35 = vmul.f32 1.442695, %v124_v34 }
 0x13c   :  { %815 = vperm.xlu1 %1649, %v224_v52  }
 0x144   :  { %1652 = vset.pattern.permute.xlu1 %v1907_v19 }
 0x18e   :  { %v726_v53 = vpop.xlane.xlu1 %725 }
 0x18f   :  { %v748_v58 = vsub.f32 %v715_v39, %v726_v53  ;;  %v546_v39 = vsel %vm463_vm0, %v536_v38, 0.0 }
 0x191   :  { %v756_v59 = vmul.f32 1.442695, %v748_v58 }
 0x196   :  { %v342_v54 = vpop.xlane.xlu1 %341 }
 0x197   :  { %v364_v55 = vsub.f32 %v1984_v10, %v342_v54 }
 0x199   :  { %v372_v56 = vmul.f32 1.442695, %v364_v55 }
 0x19b   :  { %1714 = vpow2.f32 %v372_v56 }
 0x19c   :  { %1716 = vpow2.f32 %v756_v59 }
 0x1a1   :  { %v1715_v57 = vpop.eup %1714 }
 0x1a2   :  { %396 = vrot.lane.b32.xlu2 %v1715_v57, %s1902_s18  ;;  %v1717_v60 = vpop.eup %1716 }
 0x1a3   :  { %v772_v61 = vsel %vm723_vm5, %v1717_v60, 0.0 }
 0x1ae   :  { %v816_v6 = vpop.permute.xlu1 %815 }
 0x1cb   :  { %773 = vadd.xlane.f32.xlu2 %v772_v61 }
 0x1e3   :  { %822 = vperm.xlu2 %1650, %v819_v62  }
 0x1eb   :  { %1655 = vset.pattern.permute.xlu2 %v1900_v7 }
 0x1fc   :  { %v397_v63 = vpop.permute.xlu2 %396 }
 0x1fd   :  { %v421_v0 = vsel %vm420_vm11, %v397_v63, 0.0 }
 0x20c   :  { %422 = vadd.xlane.f32.xlu2 %v421_v0 }
 0x23e   :  { %v774_v1 = vpop.xlane.xlu2 %773 }
 0x23f   :  { %1718 = vrcp.f32 %v774_v1 }
 0x245   :  { %v1719_v3 = vpop.eup %1718 }
 0x246   :  { %v804_v4 = vmul.f32 %v1719_v3, %v1717_v60  ;;  %v823_v5 = vpop.permute.xlu2 %822 }
 0x247   :  { %v825_v9 = vmul.f32 %v823_v5, %v812_v2 }
 0x248   :  { %v818_v10 = vmul.f32 %v816_v6, %v804_v4 }
 0x24a   :  { %v826_v11 = vadd.f32 %v825_v9, %v818_v10 }
 0x24c   :  { %828 = vrot.lane.b32.xlu1 %v826_v11, %s1903_s21 }
 0x27f   :  { %v423_v13 = vpop.xlane.xlu2 %422 }
 0x280   :  { %1720 = vrcp.f32 %v423_v13 }
 0x281   :  { %1722 = vpow2.f32 %v133_v35 }
 0x286   :  { %v1721_v14 = vpop.eup %1720 }
 0x287   :  { %v453_v15 = vmul.f32 %v1721_v14, %v1715_v57  ;;  %v1723_v36 = vpop.eup %1722 }
 0x288   :  { %v148_v37 = vadd.f32 1.0, %v1723_v36 }
 0x289   :  { %841 = vperm.xlu0 %1651, %v453_v15  }
 0x28a   :  { %1724 = vlog2.f32 %v148_v37 }
 0x28b   :  { %1726 = vpow2.f32 %v1604_v45 }
 0x290   :  { %v1725_v41 = vpop.eup %1724 }
 0x291   :  { %1653 = vset.pattern.permute.xlu0 %v1905_v16  ;;  %v158_v42 = vmul.f32 0.6931472, %v1725_v41  ;;  %v1727_v46 = vpop.eup %1726 }
 0x292   :  { %836 = vperm.xlu0 %1653, %v453_v15   ;;  %v204_v47 = vadd.f32 1.0, %v1727_v46 }
 0x293   :  { %v2043_v43 = vadd.f32 %v158_v42, %v108_v40 }
 0x294   :  { %1728 = vrcp.f32 %v204_v47  ;;  %v237_v52 = vand.u32 2147483648, %v204_v47  ;;  %vm231_vm13 = vweird.f32 %v204_v47  ;;  %v235_v54 = vand.u32 2147483647, %v204_v47 }
 0x295   :  { %682 = vperm.xlu2 %1655, %v2043_v43  }
 0x296   :  { %v238_v55 = vor.u32 1.1754944e-38, %v237_v52  ;;  %vm236_vm2 = vcmp.eq.f32.partialorder %v235_v54, 8.507059e+37 }
 0x29a   :  { %1654 = vset.pattern.permute.xlu0 %v1906_v18  ;;  %v1729_v48 = vpop.eup %1728 }
 0x29b   :  { %865 = vperm.xlu0 %1654, %v331_v17   ;;  %v227_v49 = vmul.f32 %v1729_v48, %v204_v47  ;;  %vm232_vm14 = vweird.f32 %v1729_v48 }
 0x29c   :  { %vm233_vm15 = vmor %vm231_vm13, %vm232_vm14 }
 0x29d   :  { %1658 = vset.pattern.permute.xlu2 %v1904_v12  ;;  %v228_v50 = vsub.f32 1.0, %v227_v49 }
 0x29f   :  { %v229_v51 = vmul.f32 %v1729_v48, %v228_v50 }
 0x2a1   :  { %v230_v53 = vadd.f32 %v1729_v48, %v229_v51 }
 0x2a3   :  { %1657 = vset.pattern.permute.xlu0 %v1901_v24  ;;  %v234_v56 = vsel %vm233_vm15, %v1729_v48, %v230_v53 }
 0x2a4   :  { %v239_v57 = vsel %vm236_vm2, %v238_v55, %v234_v56 }
 0x2a5   :  { %v900_v58 = vsub.f32 1.0, %v239_v57 }
 0x2be   :  { %v829_v22 = vpop.permute.xlu1 %828 }
 0x2bf   :  { %v830_v23 = vsel %vm827_vm12, %v829_v22, %v826_v11  ;;  %v514_v22 = vpop.f32.mrf.mxu1 }
 0x2c0   :  { %831 = vrot.lane.b32.xlu1 %v830_v23, %s1903_s21 }
 0x2c8   :  { %851 = vperm.xlu1 %1652, %v453_v15  }
 0x2d0   :  { %1656 = vset.pattern.permute.xlu1 %v1901_v24 }
 0x2ef   :  { %v683_v26 = vpop.permute.xlu2 %682 }
 0x2fb   :  { %v842_v21 = vpop.permute.xlu0 %841 }
 0x2fc   :  { %v844_v25 = vmul.f32 %v842_v21, %v826_v11 }
 0x2fe   :  { %846 = vrot.lane.b32.xlu1 %v844_v25, %s1908_s23 }
 0x304   :  { %v837_v60 = vpop.permute.xlu0 %836 }
 0x30d   :  { %v866_v4 = vpop.permute.xlu0 %865 }
 0x332   :  { %v832_v28 = vpop.permute.xlu1 %831 }
 0x333   :  { %v833_v29 = vsel %vm827_vm12, %v832_v28, %v826_v11 }
 0x334   :  { %v839_v61 = vmul.f32 %v837_v60, %v833_v29 }
 0x33a   :  { %v852_v30 = vpop.permute.xlu1 %851 }
 0x33b   :  { %v854_v31 = vmul.f32 %v852_v30, %v833_v29 }
 0x33d   :  { %856 = vrot.lane.b32.xlu1 %v854_v31, %s1909_s24 }
 0x367   :  { %547 = vadd.xlane.f32.xlu1 %v546_v39 }
 0x36f   :  { %344 = vmax.xlane.f32.xlu1 %v343_v44 }
 0x370   :  { %v847_v59 = vpop.permute.xlu1 %846 }
 0x371   :  { %v849_v62 = vadd.f32 %v847_v59, %v839_v61 }
 0x388   :  { %903 = vperm.xlu1 %1656, %v900_v58  }
 0x390   :  { %1665 = vset.pattern.permute.xlu1 %v1904_v12 }
 0x3af   :  { %v857_v63 = vpop.permute.xlu1 %856 }
 0x3b0   :  { %v859_v0 = vadd.f32 %v857_v63, %v849_v62 }
 0x3b2   :  { %v860_v1 = vmax.f32 %v859_v0, 1e-30 }
 0x3b4   :  { %1730 = vlog2.f32 %v860_v1 }
 0x3ba   :  { %v1731_v2 = vpop.eup %1730 }
 0x3bb   :  { %v862_v3 = vmul.f32 0.6931472, %v1731_v2 }
 0x3bd   :  { %v868_v5 = vmul.f32 %v866_v4, %v862_v3  ;;  %v27_v3 = vld [vmem:[%s2448_s0 + $0x10] sm:$0xff] }
 0x3be   :  { %1597 = vmatmul.msk.f32.gmra.mxu0 %vm41_vm1, %v27_v3 }
 0x3bf   :  { %v869_v6 = vmul.f32 1.442695, %v868_v5 }
 0x3c1   :  { %1732 = vpow2.f32 %v869_v6 }
 0x3c7   :  { %v1733_v9 = vpop.eup %1732 }
 0x3c8   :  { %872 = vrot.lane.b32.xlu0 %v1733_v9, %s1910_s25 }
 0x3da   :  { %v548_v10 = vpop.xlane.xlu1 %547 }
 0x3db   :  { %v568_v11 = vmax.f32 %v548_v10, 1e-16 }
 0x3dd   :  { %1734 = vrsqrt.f32 %v568_v11  ;;  %vm591_vm3 = vweird.f32 %v568_v11 }
 0x3e2   :  { %v345_v34 = vpop.xlane.xlu1 %344 }
 0x3e3   :  { %v1735_v13 = vpop.eup %1734  ;;  %v365_v35 = vsub.f32 %v2032_v27, %v345_v34 }
 0x3e4   :  { %v586_v14 = vmul.f32 %v1735_v13, %v568_v11  ;;  %vm592_vm4 = vweird.f32 %v1735_v13 }
 0x3e5   :  { %vm593_vm7 = vmor %vm591_vm3, %vm592_vm4  ;;  %v374_v36 = vmul.f32 1.442695, %v365_v35 }
 0x3e6   :  { %v587_v15 = vmul.f32 %v1735_v13, %v586_v14 }
 0x3e7   :  { %1736 = vpow2.f32 %v374_v36 }
 0x3e8   :  { %v588_v17 = vmul.f32 0.5, %v587_v15 }
 0x3ea   :  { %v589_v20 = vsub.f32 1.5, %v588_v17 }
 0x3ec   :  { %v590_v23 = vmul.f32 %v1735_v13, %v589_v20 }
 0x3ed   :  { %v1737_v37 = vpop.eup %1736 }
 0x3ee   :  { %v594_v21 = vsel %vm593_vm7, %v1735_v13, %v590_v23 }
 0x3ef   :  { %v656_v25 = vmul.f32 %v594_v21, %v514_v22 }
 0x3f1   :  { %v668_v28 = vmul.f32 %v2002_v32, %v656_v25 }
 0x3f3   :  { %v716_v29 = vmul.f32 %v683_v26, %v668_v28 }
 0x3f5   :  { %v727_v30 = vsel %vm723_vm5, %v716_v29, -inf }
 0x3f6   :  { %728 = vmax.xlane.f32.xlu0 %v727_v30 }
 0x3fa   :  { %v904_v56 = vpop.permute.xlu1 %903 }
 0x43a   :  { %v873_v31 = vpop.permute.xlu0 %872 }
 0x43b   :  { %v875_v33 = vsel %vm723_vm5, %v873_v31, 0.0 }
 0x43c   :  { %876 = vadd.xlane.f32.xlu2 %v875_v33 }
 0x454   :  { %398 = vrot.lane.b32.xlu2 %v1737_v37, %s1902_s18 }
 0x469   :  { %v729_v38 = vpop.xlane.xlu0 %728 }
 0x46a   :  { %v749_v39 = vsub.f32 %v716_v29, %v729_v38 }
 0x46c   :  { %v758_v40 = vmul.f32 1.442695, %v749_v39 }
 0x46e   :  { %1738 = vpow2.f32 %v758_v40 }
 0x474   :  { %v1739_v41 = vpop.eup %1738 }
 0x475   :  { %v775_v42 = vsel %vm723_vm5, %v1739_v41, 0.0 }
 0x476   :  { %776 = vadd.xlane.f32.xlu0 %v775_v42 }
 0x48a   :  { %896 = vperm.xlu0 %1657, %v239_v57  }
 0x492   :  { %1659 = vset.pattern.permute.xlu0 %v1907_v19 }
 0x4af   :  { %v877_v44 = vpop.xlane.xlu2 %876 }
 0x4b0   :  { %v878_v45 = vadd.f32 1e-16, %v877_v44 }
 0x4b2   :  { %1740 = vrcp.f32 %v878_v45  ;;  %v890_v48 = vand.u32 2147483648, %v878_v45  ;;  %v888_v50 = vand.u32 2147483647, %v878_v45  ;;  %vm884_vm9 = vweird.f32 %v878_v45 }
 0x4b4   :  { %v891_v52 = vor.u32 1.1754944e-38, %v890_v48  ;;  %vm889_vm13 = vcmp.eq.f32.partialorder %v888_v50, 8.507059e+37 }
 0x4b7   :  { %v399_v58 = vpop.permute.xlu2 %398 }
 0x4b8   :  { %v1741_v27 = vpop.eup %1740  ;;  %v424_v59 = vsel %vm420_vm11, %v399_v58, 0.0 }
 0x4b9   :  { %v880_v46 = vmul.f32 %v1741_v27, %v878_v45  ;;  %vm885_vm8 = vweird.f32 %v1741_v27 }
 0x4ba   :  { %vm886_vm10 = vmor %vm884_vm9, %vm885_vm8 }
 0x4bb   :  { %v881_v47 = vsub.f32 1.0, %v880_v46 }
 0x4bd   :  { %v882_v49 = vmul.f32 %v1741_v27, %v881_v47 }
 0x4bf   :  { %v883_v51 = vadd.f32 %v1741_v27, %v882_v49 }
 0x4c1   :  { %v887_v53 = vsel %vm886_vm10, %v1741_v27, %v883_v51 }
 0x4c2   :  { %v892_v54 = vsel %vm889_vm13, %v891_v52, %v887_v53 }
 0x4c3   :  { %v2059_v55 = vmul.f32 %v1733_v9, %v892_v54  ;;  %v332_v9 = vadd.f32 1.0, %v2043_v43  ;;  %v89_v43 = vpop.f32.mrf.mxu0 }
 0x4c4   :  { %v90_v15 = vadd.f32 %v1981_v8, %v89_v43 }
 0x4c5   :  { %v906_v57 = vmul.f32 %v904_v56, %v2059_v55 }
 0x4c6   :  { %1615 = vmatmul.msk.f32.gmra.mxu1 %vm463_vm0, %v90_v15  ;;  %v537_v17 = vmul.f32 %v90_v15, %v90_v15  ;;  %v346_v26 = vsel %vm339_vm6, %v90_v15, -inf  ;;  %v117_v28 = vand.u32 2147483647, %v90_v15  ;;  %v1605_v31 = vmul.f32 -1.442695, %v90_v15 }
 0x4c7   :  { %908 = vrot.lane.b32.xlu1 %v906_v57, %s1910_s25 }
 0x4c8   :  { %v549_v20 = vsel %vm463_vm0, %v537_v17, 0.0  ;;  %v125_v29 = vsub.f32 0.0, %v117_v28 }
 0x4ca   :  { %v135_v30 = vmul.f32 1.442695, %v125_v29 }
 0x4e9   :  { %v777_v60 = vpop.xlane.xlu0 %776 }
 0x4ea   :  { %1742 = vrcp.f32 %v777_v60 }
 0x4f0   :  { %v1743_v61 = vpop.eup %1742 }
 0x4f1   :  { %425 = vadd.xlane.f32.xlu1 %v424_v59  ;;  %v805_v63 = vmul.f32 %v1743_v61, %v1739_v41 }
 0x4fc   :  { %v897_v62 = vpop.permute.xlu0 %896 }
 0x4fd   :  { %v899_v0 = vmul.f32 %v897_v62, %v805_v63 }
 0x539   :  { %v909_v1 = vpop.permute.xlu1 %908 }
 0x53a   :  { %v911_v2 = vadd.f32 %v909_v1, %v899_v0 }
 0x53c   :  { %912 = vrot.lane.b32.xlu2 %v911_v2, %s1903_s21 }
 0x543   :  { %v517_v17 = vpop.f32.mrf.mxu1 }
 0x564   :  { %v426_v4 = vpop.xlane.xlu1 %425 }
 0x565   :  { %1744 = vrcp.f32 %v426_v4 }
 0x566   :  { %1746 = vpow2.f32 %v135_v30 }
 0x567   :  { %1748 = vpow2.f32 %v1605_v31 }
 0x56b   :  { %v1745_v5 = vpop.eup %1744 }
 0x56c   :  { %v454_v6 = vmul.f32 %v1745_v5, %v1737_v37  ;;  %v1747_v33 = vpop.eup %1746  ;;  %v109_v37 = vmax.f32 %v90_v15, 0.0 }
 0x56d   :  { %v149_v34 = vadd.f32 1.0, %v1747_v33  ;;  %v1749_v35 = vpop.eup %1748 }
 0x56e   :  { %935 = vperm.xlu0 %1659, %v454_v6   ;;  %925 = vperm.xlu2 %1658, %v454_v6   ;;  %v205_v36 = vadd.f32 1.0, %v1749_v35 }
 0x56f   :  { %1750 = vlog2.f32 %v149_v34 }
 0x570   :  { %1752 = vrcp.f32 %v205_v36  ;;  %v252_v44 = vand.u32 2147483648, %v205_v36  ;;  %vm246_vm14 = vweird.f32 %v205_v36  ;;  %v250_v27 = vand.u32 2147483647, %v205_v36 }
 0x572   :  { %v253_v47 = vor.u32 1.1754944e-38, %v252_v44  ;;  %vm251_vm3 = vcmp.eq.f32.partialorder %v250_v27, 8.507059e+37 }
 0x575   :  { %v1751_v38 = vpop.eup %1750 }
 0x576   :  { %1661 = vset.pattern.permute.xlu0 %v1906_v18  ;;  %1660 = vset.pattern.permute.xlu2 %v1905_v16  ;;  %v160_v39 = vmul.f32 0.6931472, %v1751_v38  ;;  %v1753_v41 = vpop.eup %1752 }
 0x577   :  { %949 = vperm.xlu0 %1661, %v332_v9   ;;  %v242_v42 = vmul.f32 %v1753_v41, %v205_v36  ;;  %vm247_vm15 = vweird.f32 %v1753_v41 }
 0x578   :  { %v2083_v40 = vadd.f32 %v160_v39, %v109_v37  ;;  %vm248_vm2 = vmor %vm246_vm14, %vm247_vm15 }
 0x579   :  { %v243_v45 = vsub.f32 1.0, %v242_v42 }
 0x57b   :  { %v244_v46 = vmul.f32 %v1753_v41, %v243_v45 }
 0x57d   :  { %v245_v48 = vadd.f32 %v1753_v41, %v244_v46 }
 0x57f   :  { %1662 = vset.pattern.permute.xlu0 %v1900_v7  ;;  %v249_v49 = vsel %vm248_vm2, %v1753_v41, %v245_v48 }
 0x580   :  { %687 = vperm.xlu0 %1662, %v2083_v40   ;;  %v254_v50 = vsel %vm251_vm3, %v253_v47, %v249_v49 }
 0x581   :  { %v984_v51 = vsub.f32 1.0, %v254_v50 }
 0x588   :  { %1664 = vset.pattern.permute.xlu0 %v1901_v24 }
 0x596   :  { %v913_v10 = vpop.permute.xlu2 %912 }
 0x597   :  { %v914_v11 = vsel %vm827_vm12, %v913_v10, %v911_v2 }
 0x598   :  { %915 = vrot.lane.b32.xlu2 %v914_v11, %s1903_s21 }
 0x5a0   :  { %920 = vperm.xlu2 %1660, %v454_v6  }
 0x5a8   :  { %1663 = vset.pattern.permute.xlu2 %v1901_v24 }
 0x5c8   :  { %v926_v13 = vpop.permute.xlu2 %925 }
 0x5c9   :  { %v928_v14 = vmul.f32 %v926_v13, %v911_v2 }
 0x5cb   :  { %930 = vrot.lane.b32.xlu2 %v928_v14, %s1908_s23 }
 0x5e0   :  { %v936_v23 = vpop.permute.xlu0 %935 }
 0x5f2   :  { %v916_v22 = vpop.permute.xlu2 %915 }
 0x5f3   :  { %v917_v21 = vsel %vm827_vm12, %v916_v22, %v911_v2  ;;  %v950_v2 = vpop.permute.xlu0 %949 }
 0x5f4   :  { %v938_v25 = vmul.f32 %v936_v23, %v917_v21  ;;  %550 = vadd.xlane.f32.xlu2 %v549_v20 }
 0x5f6   :  { %940 = vrot.lane.b32.xlu1 %v938_v25, %s1909_s24 }
 0x5fa   :  { %v921_v52 = vpop.permute.xlu2 %920 }
 0x5fb   :  { %v923_v54 = vmul.f32 %v921_v52, %v917_v21  ;;  %v688_v21 = vpop.permute.xlu0 %687 }
 0x5fc   :  { %347 = vmax.xlane.f32.xlu2 %v346_v26 }
 0x614   :  { %987 = vperm.xlu2 %1663, %v984_v51  }
 0x61c   :  { %1673 = vset.pattern.permute.xlu2 %v1907_v19 }
 0x625   :  { %v931_v53 = vpop.permute.xlu2 %930 }
 0x626   :  { %v933_v56 = vadd.f32 %v931_v53, %v923_v54 }
 0x667   :  { %v551_v57 = vpop.xlane.xlu2 %550 }
 0x668   :  { %v941_v58 = vpop.permute.xlu1 %940  ;;  %v569_v4 = vmax.f32 %v551_v57, 1e-16 }
 0x669   :  { %v943_v59 = vadd.f32 %v941_v58, %v933_v56  ;;  %v28_v56 = vld [vmem:[%s2448_s0 + $0x18] sm:$0xff] }
 0x66a   :  { %vm601_vm4 = vweird.f32 %v569_v4  ;;  %1598 = vmatmul.msk.f32.gmra.mxu0 %vm41_vm1, %v28_v56 }
 0x66b   :  { %v944_v60 = vmax.f32 %v943_v59, 1e-30 }
 0x66d   :  { %1754 = vlog2.f32 %v944_v60 }
 0x66f   :  { %v348_v61 = vpop.xlane.xlu2 %347 }
 0x670   :  { %v366_v62 = vsub.f32 %v90_v15, %v348_v61 }
 0x672   :  { %v376_v63 = vmul.f32 1.442695, %v366_v62 }
 0x673   :  { %v1755_v0 = vpop.eup %1754 }
 0x674   :  { %v946_v1 = vmul.f32 0.6931472, %v1755_v0  ;;  %1756 = vpow2.f32 %v376_v63 }
 0x676   :  { %v952_v3 = vmul.f32 %v950_v2, %v946_v1 }
 0x677   :  { %v988_v28 = vpop.permute.xlu2 %987 }
 0x678   :  { %v953_v5 = vmul.f32 1.442695, %v952_v3 }
 0x67a   :  { %v2088_v6 = vpop.eup %1756  ;;  %1758 = vpow2.f32 %v953_v5 }
 0x67b   :  { %400 = vrot.lane.b32.xlu2 %v2088_v6, %s1902_s18  ;;  %1760 = vrsqrt.f32 %v569_v4 }
 0x680   :  { %v1759_v9 = vpop.eup %1758 }
 0x681   :  { %956 = vrot.lane.b32.xlu1 %v1759_v9, %s1910_s25  ;;  %v1761_v10 = vpop.eup %1760 }
 0x682   :  { %v596_v11 = vmul.f32 %v1761_v10, %v569_v4  ;;  %vm602_vm7 = vweird.f32 %v1761_v10 }
 0x683   :  { %vm603_vm8 = vmor %vm601_vm4, %vm602_vm7 }
 0x684   :  { %v597_v13 = vmul.f32 %v1761_v10, %v596_v11 }
 0x686   :  { %v598_v14 = vmul.f32 0.5, %v597_v13 }
 0x688   :  { %v599_v43 = vsub.f32 1.5, %v598_v14 }
 0x68a   :  { %v600_v15 = vmul.f32 %v1761_v10, %v599_v43 }
 0x68c   :  { %v604_v20 = vsel %vm603_vm8, %v1761_v10, %v600_v15 }
 0x68d   :  { %v657_v22 = vmul.f32 %v604_v20, %v517_v17 }
 0x68f   :  { %v669_v23 = vmul.f32 %v2002_v32, %v657_v22 }
 0x691   :  { %v717_v25 = vmul.f32 %v688_v21, %v669_v23 }
 0x693   :  { %v730_v26 = vsel %vm723_vm5, %v717_v25, -inf }
 0x6ab   :  { %731 = vmax.xlane.f32.xlu1 %v730_v26 }
 0x6d5   :  { %v401_v29 = vpop.permute.xlu2 %400 }
 0x6d6   :  { %v427_v30 = vsel %vm420_vm11, %v401_v29, 0.0 }
 0x6d7   :  { %428 = vadd.xlane.f32.xlu2 %v427_v30 }
 0x6e7   :  { %v92_v2 = vpop.f32.mrf.mxu0 }
 0x6e8   :  { %v2112_v3 = vadd.f32 %v1981_v8, %v92_v2 }
 0x6ea   :  { %1616 = vmatmul.msk.f32.gmra.mxu1 %vm463_vm0, %v2112_v3  ;;  %v538_v10 = vmul.f32 %v2112_v3, %v2112_v3  ;;  %v349_v11 = vsel %vm339_vm6, %v2112_v3, -inf  ;;  %v118_v13 = vand.u32 2147483647, %v2112_v3  ;;  %v110_v30 = vmax.f32 %v2112_v3, 0.0 }
 0x6ec   :  { %v552_v8 = vsel %vm463_vm0, %v538_v10, 0.0  ;;  %v126_v14 = vsub.f32 0.0, %v118_v13 }
 0x6ee   :  { %v137_v43 = vmul.f32 1.442695, %v126_v14 }
 0x6f3   :  { %v957_v31 = vpop.permute.xlu1 %956 }
 0x6f4   :  { %v959_v33 = vsel %vm723_vm5, %v957_v31, 0.0 }
 0x6f5   :  { %960 = vadd.xlane.f32.xlu0 %v959_v33 }
 0x709   :  { %980 = vperm.xlu0 %1664, %v254_v50  }
 0x711   :  { %1667 = vset.pattern.permute.xlu0 %v1905_v16 }
 0x71e   :  { %v732_v34 = vpop.xlane.xlu1 %731 }
 0x71f   :  { %v750_v35 = vsub.f32 %v717_v25, %v732_v34  ;;  %v1606_v25 = vmul.f32 -1.442695, %v2112_v3 }
 0x721   :  { %v760_v36 = vmul.f32 1.442695, %v750_v35 }
 0x723   :  { %1762 = vpow2.f32 %v760_v36 }
 0x729   :  { %v1763_v37 = vpop.eup %1762 }
 0x72a   :  { %v778_v38 = vsel %vm723_vm5, %v1763_v37, 0.0 }
 0x72b   :  { %779 = vadd.xlane.f32.xlu1 %v778_v38 }
 0x74a   :  { %v429_v59 = vpop.xlane.xlu2 %428 }
 0x768   :  { %v961_v39 = vpop.xlane.xlu0 %960 }
 0x769   :  { %v962_v41 = vadd.f32 1e-16, %v961_v39 }
 0x76b   :  { %1764 = vrcp.f32 %v962_v41  ;;  %v974_v27 = vand.u32 2147483648, %v962_v41  ;;  %v972_v47 = vand.u32 2147483647, %v962_v41  ;;  %vm968_vm10 = vweird.f32 %v962_v41 }
 0x76d   :  { %v975_v49 = vor.u32 1.1754944e-38, %v974_v27  ;;  %vm973_vm14 = vcmp.eq.f32.partialorder %v972_v47, 8.507059e+37 }
 0x771   :  { %v1765_v42 = vpop.eup %1764 }
 0x772   :  { %v964_v44 = vmul.f32 %v1765_v42, %v962_v41  ;;  %vm969_vm9 = vweird.f32 %v1765_v42 }
 0x773   :  { %vm970_vm13 = vmor %vm968_vm10, %vm969_vm9 }
 0x774   :  { %v965_v45 = vsub.f32 1.0, %v964_v44 }
 0x776   :  { %v966_v46 = vmul.f32 %v1765_v42, %v965_v45 }
 0x778   :  { %v967_v48 = vadd.f32 %v1765_v42, %v966_v46 }
 0x77a   :  { %v971_v50 = vsel %vm970_vm13, %v1765_v42, %v967_v48 }
 0x77b   :  { %v976_v51 = vsel %vm973_vm14, %v975_v49, %v971_v50  ;;  %v981_v60 = vpop.permute.xlu0 %980 }
 0x77c   :  { %v2099_v52 = vmul.f32 %v1759_v9, %v976_v51 }
 0x77e   :  { %v990_v53 = vmul.f32 %v988_v28, %v2099_v52  ;;  %v333_v28 = vadd.f32 1.0, %v2083_v40 }
 0x780   :  { %992 = vrot.lane.b32.xlu1 %v990_v53, %s1910_s25 }
 0x79e   :  { %v780_v54 = vpop.xlane.xlu1 %779 }
 0x79f   :  { %1766 = vrcp.f32 %v780_v54 }
 0x7a0   :  { %1768 = vrcp.f32 %v429_v59 }
 0x7a1   :  { %1770 = vpow2.f32 %v137_v43 }
 0x7a5   :  { %v1767_v57 = vpop.eup %1766 }
 0x7a6   :  { %v806_v58 = vmul.f32 %v1767_v57, %v1763_v37  ;;  %v1769_v0 = vpop.eup %1768 }
 0x7a7   :  { %v455_v1 = vmul.f32 %v1769_v0, %v2088_v6  ;;  %v1771_v15 = vpop.eup %1770 }
 0x7a8   :  { %v983_v61 = vmul.f32 %v981_v60, %v806_v58  ;;  %v150_v20 = vadd.f32 1.0, %v1771_v15 }
 0x7aa   :  { %1772 = vlog2.f32 %v150_v20 }
 0x7ab   :  { %1774 = vpow2.f32 %v1606_v25 }
 0x7b0   :  { %v1773_v26 = vpop.eup %1772 }
 0x7b1   :  { %v1775_v29 = vpop.eup %1774  ;;  %v162_v31 = vmul.f32 0.6931472, %v1773_v26 }
 0x7b2   :  { %v206_v33 = vadd.f32 1.0, %v1775_v29 }
 0x7b3   :  { %v2131_v34 = vadd.f32 %v162_v31, %v110_v30 }
 0x7b4   :  { %1776 = vrcp.f32 %v206_v33  ;;  %v267_v39 = vand.u32 2147483648, %v206_v33  ;;  %vm261_vm15 = vweird.f32 %v206_v33  ;;  %v265_v40 = vand.u32 2147483647, %v206_v33 }
 0x7b6   :  { %v268_v42 = vor.u32 1.1754944e-38, %v267_v39  ;;  %vm266_vm4 = vcmp.eq.f32.partialorder %v265_v40, 8.507059e+37 }
 0x7ba   :  { %v1777_v35 = vpop.eup %1776 }
 0x7bb   :  { %v257_v36 = vmul.f32 %v1777_v35, %v206_v33  ;;  %vm262_vm2 = vweird.f32 %v1777_v35 }
 0x7bc   :  { %vm263_vm3 = vmor %vm261_vm15, %vm262_vm2 }
 0x7bd   :  { %v258_v37 = vsub.f32 1.0, %v257_v36 }
 0x7bf   :  { %v259_v38 = vmul.f32 %v1777_v35, %v258_v37 }
 0x7c1   :  { %v260_v41 = vadd.f32 %v1777_v35, %v259_v38 }
 0x7c3   :  { %v264_v44 = vsel %vm263_vm3, %v1777_v35, %v260_v41 }
 0x7c4   :  { %v269_v45 = vsel %vm266_vm4, %v268_v42, %v264_v44 }
 0x7c5   :  { %v1068_v27 = vsub.f32 1.0, %v269_v45 }
 0x7f2   :  { %v993_v62 = vpop.permute.xlu1 %992 }
 0x7f3   :  { %v995_v63 = vadd.f32 %v993_v62, %v983_v61 }
 0x7f5   :  { %996 = vrot.lane.b32.xlu1 %v995_v63, %s1903_s21 }
 0x7fd   :  { %1009 = vperm.xlu1 %1665, %v455_v1  }
 0x805   :  { %1666 = vset.pattern.permute.xlu1 %v1907_v19 }
 0x806   :  { %1019 = vperm.xlu1 %1666, %v455_v1  }
 0x80e   :  { %1668 = vset.pattern.permute.xlu1 %v1906_v18 }
 0x867   :  { %v997_v4 = vpop.permute.xlu1 %996 }
 0x868   :  { %v998_v5 = vsel %vm827_vm12, %v997_v4, %v995_v63 }
 0x869   :  { %999 = vrot.lane.b32.xlu0 %v998_v5, %s1903_s21 }
 0x86f   :  { %v1010_v9 = vpop.permute.xlu1 %1009 }
 0x870   :  { %v1012_v6 = vmul.f32 %v1010_v9, %v995_v63 }
 0x871   :  { %1004 = vperm.xlu0 %1667, %v455_v1  }
 0x872   :  { %1014 = vrot.lane.b32.xlu2 %v1012_v6, %s1908_s23 }
 0x878   :  { %v1020_v22 = vpop.permute.xlu1 %1019 }
 0x879   :  { %1670 = vset.pattern.permute.xlu0 %v1901_v24 }
 0x89b   :  { %553 = vadd.xlane.f32.xlu0 %v552_v8 }
 0x8a3   :  { %350 = vmax.xlane.f32.xlu0 %v349_v11 }
 0x8b7   :  { %1071 = vperm.xlu0 %1670, %v1068_v27  }
 0x8bf   :  { %1672 = vset.pattern.permute.xlu0 %v1904_v12 }
 0x8cc   :  { %v1015_v56 = vpop.permute.xlu2 %1014 }
 0x8db   :  { %v1000_v17 = vpop.permute.xlu0 %999 }
 0x8dc   :  { %v1001_v23 = vsel %vm827_vm12, %v1000_v17, %v995_v63  ;;  %v520_v63 = vpop.f32.mrf.mxu1 }
 0x8dd   :  { %v1022_v21 = vmul.f32 %v1020_v22, %v1001_v23 }
 0x8df   :  { %1024 = vrot.lane.b32.xlu1 %v1022_v21, %s1909_s24 }
 0x8e3   :  { %v1005_v46 = vpop.permute.xlu0 %1004 }
 0x8e4   :  { %v1007_v53 = vmul.f32 %v1005_v46, %v1001_v23 }
 0x8e6   :  { %v1017_v57 = vadd.f32 %v1015_v56, %v1007_v53  ;;  %v29_v56 = vld [vmem:[%s2448_s0 + $0x20] sm:$0xff] }
 0x8e7   :  { %1033 = vperm.xlu1 %1668, %v333_v28   ;;  %1599 = vmatmul.msk.f32.gmra.mxu0 %vm41_vm1, %v29_v56 }
 0x8ef   :  { %1669 = vset.pattern.permute.xlu1 %v1900_v7 }
 0x8f0   :  { %692 = vperm.xlu1 %1669, %v2131_v34  }
 0x8f8   :  { %1671 = vset.pattern.permute.xlu1 %v1901_v24 }
 0x90e   :  { %v554_v47 = vpop.xlane.xlu0 %553 }
 0x90f   :  { %v570_v48 = vmax.f32 %v554_v47, 1e-16 }
 0x911   :  { %1778 = vrsqrt.f32 %v570_v48  ;;  %vm611_vm7 = vweird.f32 %v570_v48 }
 0x916   :  { %v351_v17 = vpop.xlane.xlu0 %350 }
 0x917   :  { %v1779_v49 = vpop.eup %1778  ;;  %v367_v20 = vsub.f32 %v2112_v3, %v351_v17 }
 0x918   :  { %v606_v50 = vmul.f32 %v1779_v49, %v570_v48  ;;  %vm612_vm8 = vweird.f32 %v1779_v49 }
 0x919   :  { %vm613_vm9 = vmor %vm611_vm7, %vm612_vm8  ;;  %v378_v22 = vmul.f32 1.442695, %v367_v20 }
 0x91a   :  { %v607_v51 = vmul.f32 %v1779_v49, %v606_v50 }
 0x91c   :  { %v608_v54 = vmul.f32 0.5, %v607_v51 }
 0x91e   :  { %v609_v58 = vsub.f32 1.5, %v608_v54 }
 0x920   :  { %v610_v62 = vmul.f32 %v1779_v49, %v609_v58 }
 0x922   :  { %v614_v0 = vsel %vm613_vm9, %v1779_v49, %v610_v62 }
 0x923   :  { %v658_v2 = vmul.f32 %v614_v0, %v520_v63 }
 0x925   :  { %v670_v6 = vmul.f32 %v2002_v32, %v658_v2 }
 0x929   :  { %v1072_v27 = vpop.permute.xlu0 %1071 }
 0x951   :  { %v1025_v59 = vpop.permute.xlu1 %1024 }
 0x952   :  { %v1027_v60 = vadd.f32 %v1025_v59, %v1017_v57 }
 0x954   :  { %v1028_v61 = vmax.f32 %v1027_v60, 1e-30  ;;  %v334_v60 = vadd.f32 1.0, %v2131_v34  ;;  %v2166_v34 = vld [vmem:[%s2447_s2] ss:$0 sm:$0xff] }
 0x956   :  { %1780 = vlog2.f32 %v1028_v61 }
 0x959   :  { %v1034_v1 = vpop.permute.xlu1 %1033 }
 0x95c   :  { %v1781_v4 = vpop.eup %1780 }
 0x95d   :  { %v1030_v5 = vmul.f32 0.6931472, %v1781_v4 }
 0x95f   :  { %v1036_v9 = vmul.f32 %v1034_v1, %v1030_v5 }
 0x961   :  { %v1037_v10 = vmul.f32 1.442695, %v1036_v9 }
 0x962   :  { %v693_v8 = vpop.permute.xlu1 %692 }
 0x963   :  { %1782 = vpow2.f32 %v1037_v10  ;;  %v718_v11 = vmul.f32 %v693_v8, %v670_v6 }
 0x964   :  { %1784 = vpow2.f32 %v378_v22  ;;  %v95_v1 = vpop.f32.mrf.mxu0 }
 0x965   :  { %v733_v13 = vsel %vm723_vm5, %v718_v11, -inf  ;;  %v2169_v2 = vadd.f32 %v2166_v34, %v95_v1 }
 0x966   :  { %734 = vmax.xlane.f32.xlu1 %v733_v13 }
 0x967   :  { %1617 = vmatmul.msk.f32.gmra.mxu1 %vm463_vm0, %v2169_v2  ;;  %v119_v4 = vand.u32 2147483647, %v2169_v2  ;;  %v1607_v22 = vmul.f32 -1.442695, %v2169_v2 }
 0x969   :  { %v1783_v14 = vpop.eup %1782  ;;  %v127_v5 = vsub.f32 0.0, %v119_v4 }
 0x96a   :  { %1040 = vrot.lane.b32.xlu2 %v1783_v14, %s1910_s25  ;;  %v1785_v25 = vpop.eup %1784 }
 0x96b   :  { %v139_v6 = vmul.f32 1.442695, %v127_v5  ;;  %v2191_v5 = vld [vmem:[%s2449_s4] ss:$0 sm:$0xff] }
 0x9c4   :  { %v1041_v43 = vpop.permute.xlu2 %1040 }
 0x9c5   :  { %v1043_v15 = vsel %vm723_vm5, %v1041_v43, 0.0 }
 0x9c6   :  { %1044 = vadd.xlane.f32.xlu2 %v1043_v15  ;;  %v111_v15 = vmax.f32 %v2169_v2, 0.0 }
 0x9d9   :  { %v735_v32 = vpop.xlane.xlu1 %734 }
 0x9da   :  { %v751_v23 = vsub.f32 %v718_v11, %v735_v32 }
 0x9dc   :  { %v762_v21 = vmul.f32 1.442695, %v751_v23  ;;  %v539_v23 = vmul.f32 %v2169_v2, %v2169_v2 }
 0x9de   :  { %1786 = vpow2.f32 %v762_v21  ;;  %402 = vrot.lane.b32.xlu2 %v1785_v25, %s1902_s18 }
 0x9e4   :  { %v1787_v26 = vpop.eup %1786 }
 0x9e5   :  { %v781_v28 = vsel %vm723_vm5, %v1787_v26, 0.0 }
 0x9e6   :  { %782 = vadd.xlane.f32.xlu1 %v781_v28  ;;  %v352_v28 = vsel %vm339_vm6, %v2169_v2, -inf }
 0x9ff   :  { %1064 = vperm.xlu1 %1671, %v269_v45  }
 0xa07   :  { %1676 = vset.pattern.permute.xlu1 %v1900_v7 }
 0xa39   :  { %v1045_v29 = vpop.xlane.xlu2 %1044 }
 0xa3a   :  { %v1046_v30 = vadd.f32 1e-16, %v1045_v29 }
 0xa3c   :  { %1788 = vrcp.f32 %v1046_v30  ;;  %v1058_v37 = vand.u32 2147483648, %v1046_v30  ;;  %v1056_v39 = vand.u32 2147483647, %v1046_v30  ;;  %vm1052_vm13 = vweird.f32 %v1046_v30 }
 0xa3e   :  { %v1059_v40 = vor.u32 1.1754944e-38, %v1058_v37  ;;  %vm1057_vm15 = vcmp.eq.f32.partialorder %v1056_v39, 8.507059e+37 }
 0xa41   :  { %v403_v3 = vpop.permute.xlu2 %402 }
 0xa42   :  { %v1789_v31 = vpop.eup %1788  ;;  %v430_v33 = vsel %vm420_vm11, %v403_v3, 0.0 }
 0xa43   :  { %v1048_v35 = vmul.f32 %v1789_v31, %v1046_v30  ;;  %431 = vadd.xlane.f32.xlu1 %v430_v33  ;;  %vm1053_vm10 = vweird.f32 %v1789_v31 }
 0xa44   :  { %vm1054_vm14 = vmor %vm1052_vm13, %vm1053_vm10 }
 0xa45   :  { %v1049_v36 = vsub.f32 1.0, %v1048_v35 }
 0xa47   :  { %v1050_v38 = vmul.f32 %v1789_v31, %v1049_v36 }
 0xa49   :  { %v1051_v41 = vadd.f32 %v1789_v31, %v1050_v38 }
 0xa4b   :  { %v1055_v42 = vsel %vm1054_vm14, %v1789_v31, %v1051_v41 }
 0xa4c   :  { %v1060_v44 = vsel %vm1057_vm15, %v1059_v40, %v1055_v42 }
 0xa4d   :  { %v2146_v45 = vmul.f32 %v1783_v14, %v1060_v44 }
 0xa4f   :  { %v1074_v46 = vmul.f32 %v1072_v27, %v2146_v45 }
 0xa51   :  { %1076 = vrot.lane.b32.xlu2 %v1074_v46, %s1910_s25 }
 0xa59   :  { %v783_v47 = vpop.xlane.xlu1 %782 }
 0xa5a   :  { %1790 = vrcp.f32 %v783_v47 }
 0xa60   :  { %v1791_v48 = vpop.eup %1790 }
 0xa61   :  { %v807_v50 = vmul.f32 %v1791_v48, %v1787_v26 }
 0xa71   :  { %v1065_v49 = vpop.permute.xlu1 %1064 }
 0xa72   :  { %v1067_v51 = vmul.f32 %v1065_v49, %v807_v50 }
 0xaab   :  { %v1077_v53 = vpop.permute.xlu2 %1076 }
 0xaac   :  { %v1079_v54 = vadd.f32 %v1077_v53, %v1067_v51 }
 0xaae   :  { %1080 = vrot.lane.b32.xlu2 %v1079_v54, %s1903_s21 }
 0xab6   :  { %v432_v57 = vpop.xlane.xlu1 %431 }
 0xab7   :  { %1792 = vrcp.f32 %v432_v57 }
 0xab8   :  { %1794 = vpow2.f32 %v139_v6 }
 0xabd   :  { %v1793_v58 = vpop.eup %1792 }
 0xabe   :  { %v456_v59 = vmul.f32 %v1793_v58, %v1785_v25  ;;  %v1795_v10 = vpop.eup %1794  ;;  %v555_v25 = vsel %vm463_vm0, %v539_v23, 0.0 }
 0xabf   :  { %v151_v14 = vadd.f32 1.0, %v1795_v10 }
 0xac0   :  { %1093 = vperm.xlu0 %1672, %v456_v59  }
 0xac1   :  { %1796 = vlog2.f32 %v151_v14 }
 0xac2   :  { %1798 = vpow2.f32 %v1607_v22 }
 0xac7   :  { %v1797_v43 = vpop.eup %1796 }
 0xac8   :  { %1674 = vset.pattern.permute.xlu0 %v1905_v16  ;;  %v164_v17 = vmul.f32 0.6931472, %v1797_v43  ;;  %v1799_v32 = vpop.eup %1798 }
 0xac9   :  { %1088 = vperm.xlu0 %1674, %v456_v59   ;;  %v207_v21 = vadd.f32 1.0, %v1799_v32 }
 0xaca   :  { %v2177_v20 = vadd.f32 %v164_v17, %v111_v15 }
 0xacb   :  { %1800 = vrcp.f32 %v207_v21  ;;  %vm276_vm2 = vweird.f32 %v207_v21  ;;  %v282_v31 = vand.u32 2147483648, %v207_v21  ;;  %v280_v35 = vand.u32 2147483647, %v207_v21 }
 0xacc   :  { %697 = vperm.xlu1 %1676, %v2177_v20  }
 0xacd   :  { %v283_v36 = vor.u32 1.1754944e-38, %v282_v31  ;;  %vm281_vm7 = vcmp.eq.f32.partialorder %v280_v35, 8.507059e+37 }
 0xad1   :  { %1675 = vset.pattern.permute.xlu0 %v1906_v18  ;;  %v1801_v26 = vpop.eup %1800 }
 0xad2   :  { %1117 = vperm.xlu0 %1675, %v334_v60   ;;  %v272_v29 = vmul.f32 %v1801_v26, %v207_v21  ;;  %vm277_vm3 = vweird.f32 %v1801_v26 }
 0xad3   :  { %vm278_vm4 = vmor %vm276_vm2, %vm277_vm3 }
 0xad4   :  { %1678 = vset.pattern.permute.xlu1 %v1901_v24  ;;  %v273_v30 = vsub.f32 1.0, %v272_v29 }
 0xad6   :  { %v274_v3 = vmul.f32 %v1801_v26, %v273_v30 }
 0xad8   :  { %v275_v33 = vadd.f32 %v1801_v26, %v274_v3 }
 0xada   :  { %1681 = vset.pattern.permute.xlu0 %v1905_v16  ;;  %v279_v37 = vsel %vm278_vm4, %v1801_v26, %v275_v33 }
 0xadb   :  { %v284_v38 = vsel %vm281_vm7, %v283_v36, %v279_v37 }
 0xadc   :  { %v1152_v39 = vsub.f32 1.0, %v284_v38 }
 0xb08   :  { %v1081_v61 = vpop.permute.xlu2 %1080 }
 0xb09   :  { %v1082_v62 = vsel %vm827_vm12, %v1081_v61, %v1079_v54 }
 0xb0a   :  { %1083 = vrot.lane.b32.xlu2 %v1082_v62, %s1903_s21 }
 0xb12   :  { %1103 = vperm.xlu2 %1673, %v456_v59  }
 0xb1a   :  { %1677 = vset.pattern.permute.xlu2 %v1901_v24 }
 0xb32   :  { %v1094_v63 = vpop.permute.xlu0 %1093 }
 0xb33   :  { %v1096_v0 = vmul.f32 %v1094_v63, %v1079_v54 }
 0xb35   :  { %1098 = vrot.lane.b32.xlu2 %v1096_v0, %s1908_s23  ;;  %v523_v0 = vpop.f32.mrf.mxu1 }
 0xb3b   :  { %v1089_v40 = vpop.permute.xlu0 %1088 }
 0xb3e   :  { %v698_v6 = vpop.permute.xlu1 %697 }
 0xb44   :  { %v1118_v50 = vpop.permute.xlu0 %1117 }
 0xb64   :  { %v1084_v9 = vpop.permute.xlu2 %1083 }
 0xb65   :  { %v1085_v8 = vsel %vm827_vm12, %v1084_v9, %v1079_v54 }
 0xb66   :  { %v1091_v42 = vmul.f32 %v1089_v40, %v1085_v8 }
 0xb6c   :  { %v1104_v11 = vpop.permute.xlu2 %1103 }
 0xb6d   :  { %v1106_v13 = vmul.f32 %v1104_v11, %v1085_v8 }
 0xb6f   :  { %1108 = vrot.lane.b32.xlu2 %v1106_v13, %s1909_s24 }
 0xb8f   :  { %v1099_v41 = vpop.permute.xlu2 %1098 }
 0xb90   :  { %v1101_v44 = vadd.f32 %v1099_v41, %v1091_v42  ;;  %v30_v42 = vld [vmem:[%s2448_s0 + $0x28] sm:$0xff] }
 0xb91   :  { %1600 = vmatmul.msk.f32.gmra.mxu0 %vm41_vm1, %v30_v42 }
 0xb98   :  { %556 = vadd.xlane.f32.xlu2 %v555_v25 }
 0xba0   :  { %353 = vmax.xlane.f32.xlu2 %v352_v28 }
 0xbb8   :  { %1155 = vperm.xlu2 %1677, %v1152_v39  }
 0xbc9   :  { %v1109_v27 = vpop.permute.xlu2 %1108 }
 0xbca   :  { %v1111_v46 = vadd.f32 %v1109_v27, %v1101_v44 }
 0xbcc   :  { %v1112_v47 = vmax.f32 %v1111_v46, 1e-30 }
 0xbce   :  { %1802 = vlog2.f32 %v1112_v47 }
 0xbd4   :  { %v1803_v48 = vpop.eup %1802 }
 0xbd5   :  { %v1114_v49 = vmul.f32 0.6931472, %v1803_v48 }
 0xbd7   :  { %v1120_v51 = vmul.f32 %v1118_v50, %v1114_v49 }
 0xbd9   :  { %v1121_v53 = vmul.f32 1.442695, %v1120_v51 }
 0xbdb   :  { %1804 = vpow2.f32 %v1121_v53 }
 0xbe1   :  { %v1805_v54 = vpop.eup %1804 }
 0xbe2   :  { %1124 = vrot.lane.b32.xlu0 %v1805_v54, %s1910_s25 }
 0xc0b   :  { %v557_v56 = vpop.xlane.xlu2 %556 }
 0xc0c   :  { %v571_v57 = vmax.f32 %v557_v56, 1e-16 }
 0xc0e   :  { %1806 = vrsqrt.f32 %v571_v57  ;;  %vm621_vm9 = vweird.f32 %v571_v57  ;;  %v98_v56 = vpop.f32.mrf.mxu0 }
 0xc13   :  { %v354_v32 = vpop.xlane.xlu2 %353 }
 0xc14   :  { %v1807_v58 = vpop.eup %1806  ;;  %v368_v23 = vsub.f32 %v2169_v2, %v354_v32 }
 0xc15   :  { %v616_v59 = vmul.f32 %v1807_v58, %v571_v57  ;;  %vm622_vm8 = vweird.f32 %v1807_v58  ;;  %v2211_v57 = vadd.f32 %v2166_v34, %v98_v56 }
 0xc16   :  { %vm623_vm10 = vmor %vm621_vm9, %vm622_vm8  ;;  %v380_v21 = vmul.f32 1.442695, %v368_v23 }
 0xc17   :  { %v617_v60 = vmul.f32 %v1807_v58, %v616_v59  ;;  %1618 = vmatmul.msk.f32.gmra.mxu1 %vm463_vm0, %v2211_v57 }
 0xc19   :  { %v618_v61 = vmul.f32 0.5, %v617_v60 }
 0xc1b   :  { %v619_v62 = vsub.f32 1.5, %v618_v61  ;;  %v1156_v41 = vpop.permute.xlu2 %1155 }
 0xc1d   :  { %v620_v63 = vmul.f32 %v1807_v58, %v619_v62 }
 0xc1f   :  { %v624_v1 = vsel %vm623_vm10, %v1807_v58, %v620_v63  ;;  %v540_v58 = vmul.f32 %v2211_v57, %v2211_v57 }
 0xc20   :  { %v659_v4 = vmul.f32 %v624_v1, %v523_v0  ;;  %v335_v0 = vadd.f32 1.0, %v2177_v20  ;;  %v120_v1 = vand.u32 2147483647, %v2211_v57 }
 0xc21   :  { %v558_v59 = vsel %vm463_vm0, %v540_v58, 0.0 }
 0xc22   :  { %v671_v9 = vmul.f32 %v2191_v5, %v659_v4  ;;  %v128_v4 = vsub.f32 0.0, %v120_v1 }
 0xc24   :  { %v719_v10 = vmul.f32 %v698_v6, %v671_v9  ;;  %v141_v9 = vmul.f32 1.442695, %v128_v4 }
 0xc26   :  { %v736_v8 = vsel %vm723_vm5, %v719_v10, -inf }
 0xc27   :  { %737 = vmax.xlane.f32.xlu0 %v736_v8 }
 0xc54   :  { %v1125_v11 = vpop.permute.xlu0 %1124 }
 0xc55   :  { %v1127_v13 = vsel %vm723_vm5, %v1125_v11, 0.0 }
 0xc56   :  { %1128 = vadd.xlane.f32.xlu1 %v1127_v13 }
 0xc6f   :  { %1148 = vperm.xlu1 %1678, %v284_v38  }
 0xc77   :  { %1679 = vset.pattern.permute.xlu1 %v1904_v12 }
 0xc9a   :  { %v738_v14 = vpop.xlane.xlu0 %737 }
 0xc9b   :  { %v752_v43 = vsub.f32 %v719_v10, %v738_v14 }
 0xc9d   :  { %v764_v15 = vmul.f32 1.442695, %v752_v43 }
 0xc9f   :  { %1808 = vpow2.f32 %v764_v15 }
 0xca0   :  { %1810 = vpow2.f32 %v380_v21 }
 0xca5   :  { %v1809_v17 = vpop.eup %1808 }
 0xca6   :  { %v784_v22 = vsel %vm723_vm5, %v1809_v17, 0.0  ;;  %v1811_v25 = vpop.eup %1810 }
 0xca7   :  { %785 = vadd.xlane.f32.xlu0 %v784_v22 }
 0xcbb   :  { %404 = vrot.lane.b32.xlu0 %v1811_v25, %s1902_s18 }
 0xcc9   :  { %v1129_v26 = vpop.xlane.xlu1 %1128 }
 0xcca   :  { %v1130_v28 = vadd.f32 1e-16, %v1129_v26 }
 0xccc   :  { %1812 = vrcp.f32 %v1130_v28  ;;  %v1142_v31 = vand.u32 2147483648, %v1130_v28  ;;  %v1140_v35 = vand.u32 2147483647, %v1130_v28  ;;  %vm1136_vm14 = vweird.f32 %v1130_v28 }
 0xcce   :  { %v1143_v37 = vor.u32 1.1754944e-38, %v1142_v31  ;;  %vm1141_vm2 = vcmp.eq.f32.partialorder %v1140_v35, 8.507059e+37 }
 0xcd2   :  { %v1813_v29 = vpop.eup %1812 }
 0xcd3   :  { %v1132_v30 = vmul.f32 %v1813_v29, %v1130_v28  ;;  %vm1137_vm13 = vweird.f32 %v1813_v29 }
 0xcd4   :  { %vm1138_vm15 = vmor %vm1136_vm14, %vm1137_vm13 }
 0xcd5   :  { %v1133_v3 = vsub.f32 1.0, %v1132_v30 }
 0xcd7   :  { %v1134_v33 = vmul.f32 %v1813_v29, %v1133_v3 }
 0xcd9   :  { %v1135_v36 = vadd.f32 %v1813_v29, %v1134_v33 }
 0xcdb   :  { %v1139_v2 = vsel %vm1138_vm15, %v1813_v29, %v1135_v36  ;;  %v1608_v29 = vmul.f32 -1.442695, %v2211_v57 }
 0xcdc   :  { %v1144_v38 = vsel %vm1141_vm2, %v1143_v37, %v1139_v2  ;;  %v526_v37 = vpop.f32.mrf.mxu1 }
 0xcdd   :  { %v2200_v39 = vmul.f32 %v1805_v54, %v1144_v38 }
 0xcdf   :  { %v1158_v40 = vmul.f32 %v1156_v41, %v2200_v39 }
 0xce1   :  { %1160 = vrot.lane.b32.xlu2 %v1158_v40, %s1910_s25  ;;  %v1149_v49 = vpop.permute.xlu1 %1148 }
 0xd1a   :  { %v786_v44 = vpop.xlane.xlu0 %785 }
 0xd1b   :  { %1814 = vrcp.f32 %v786_v44 }
 0xd21   :  { %v1815_v47 = vpop.eup %1814 }
 0xd22   :  { %v808_v48 = vmul.f32 %v1815_v47, %v1809_v17 }
 0xd24   :  { %v1151_v50 = vmul.f32 %v1149_v49, %v808_v48 }
 0xd2d   :  { %v405_v27 = vpop.permute.xlu0 %404 }
 0xd2e   :  { %v433_v46 = vsel %vm420_vm11, %v405_v27, 0.0 }
 0xd2f   :  { %434 = vadd.xlane.f32.xlu2 %v433_v46 }
 0xd37   :  { %559 = vadd.xlane.f32.xlu2 %v558_v59 }
 0xd3b   :  { %v1161_v51 = vpop.permute.xlu2 %1160 }
 0xd3c   :  { %v1163_v53 = vadd.f32 %v1161_v51, %v1151_v50 }
 0xd3e   :  { %1164 = vrot.lane.b32.xlu0 %v1163_v53, %s1903_s21 }
 0xda2   :  { %v435_v54 = vpop.xlane.xlu2 %434 }
 0xda3   :  { %1816 = vrcp.f32 %v435_v54 }
 0xda4   :  { %1818 = vpow2.f32 %v141_v9 }
 0xda9   :  { %v1817_v60 = vpop.eup %1816 }
 0xdaa   :  { %v457_v61 = vmul.f32 %v1817_v60, %v1811_v25  ;;  %v1819_v6 = vpop.eup %1818  ;;  %v560_v32 = vpop.xlane.xlu2 %559 }
 0xdab   :  { %v152_v10 = vadd.f32 1.0, %v1819_v6  ;;  %v572_v23 = vmax.f32 %v560_v32, 1e-16 }
 0xdac   :  { %1177 = vperm.xlu1 %1679, %v457_v61  }
 0xdad   :  { %1820 = vlog2.f32 %v152_v10  ;;  %vm631_vm3 = vweird.f32 %v572_v23 }
 0xdae   :  { %1822 = vrsqrt.f32 %v572_v23 }
 0xdaf   :  { %1824 = vpow2.f32 %v1608_v29 }
 0xdb0   :  { %v1165_v62 = vpop.permute.xlu0 %1164 }
 0xdb1   :  { %v1166_v63 = vsel %vm827_vm12, %v1165_v62, %v1163_v53 }
 0xdb2   :  { %1167 = vrot.lane.b32.xlu0 %v1166_v63, %s1903_s21 }
 0xdb3   :  { %v1821_v14 = vpop.eup %1820 }
 0xdb4   :  { %1680 = vset.pattern.permute.xlu1 %v1907_v19  ;;  %v166_v17 = vmul.f32 0.6931472, %v1821_v14  ;;  %v1823_v21 = vpop.eup %1822 }
 0xdb5   :  { %1187 = vperm.xlu1 %1680, %v457_v61   ;;  %v626_v25 = vmul.f32 %v1823_v21, %v572_v23  ;;  %vm632_vm4 = vweird.f32 %v1823_v21  ;;  %v1825_v35 = vpop.eup %1824 }
 0xdb6   :  { %vm633_vm7 = vmor %vm631_vm3, %vm632_vm4  ;;  %v208_v40 = vadd.f32 1.0, %v1825_v35 }
 0xdb7   :  { %v627_v26 = vmul.f32 %v1823_v21, %v626_v25  ;;  %v31_v25 = vld [vmem:[%s2448_s0 + $0x30] sm:$0xff] }
 0xdb8   :  { %1826 = vrcp.f32 %v208_v40  ;;  %vm291_vm8 = vweird.f32 %v208_v40  ;;  %v297_v63 = vand.u32 2147483648, %v208_v40  ;;  %v295_v1 = vand.u32 2147483647, %v208_v40  ;;  %1601 = vmatmul.msk.f32.vlgmr.msra.gmra.mxu3 %vm41_vm1, %v31_v25 }
 0xdb9   :  { %v628_v28 = vmul.f32 0.5, %v627_v26  ;;  %v1898_v26 = vld [vmem:[%s2446_s3 + $0x8] sm:$0xff] }
 0xdba   :  { %1172 = vperm.xlu0 %1681, %v457_v61   ;;  %v298_v4 = vor.u32 1.1754944e-38, %v297_v63  ;;  %vm296_vm13 = vcmp.eq.f32.partialorder %v295_v1, 8.507059e+37  ;;  %1635 = vmatpush.msra.mxu3 %v1898_v26 }
 0xdbb   :  { %v629_v30 = vsub.f32 1.5, %v628_v28 }
 0xdbd   :  { %1683 = vset.pattern.permute.xlu1 %v1900_v7  ;;  %v630_v33 = vmul.f32 %v1823_v21, %v629_v30 }
 0xdbe   :  { %v1827_v49 = vpop.eup %1826 }
 0xdbf   :  { %v634_v2 = vsel %vm633_vm7, %v1823_v21, %v630_v33  ;;  %v287_v56 = vmul.f32 %v1827_v49, %v208_v40  ;;  %vm292_vm9 = vweird.f32 %v1827_v49 }
 0xdc0   :  { %v660_v44 = vmul.f32 %v634_v2, %v526_v37  ;;  %vm293_vm10 = vmor %vm291_vm8, %vm292_vm9 }
 0xdc1   :  { %v288_v60 = vsub.f32 1.0, %v287_v56 }
 0xdc2   :  { %1682 = vset.pattern.permute.xlu0 %v1906_v18  ;;  %v672_v46 = vmul.f32 %v2191_v5, %v660_v44 }
 0xdc3   :  { %1201 = vperm.xlu0 %1682, %v335_v0   ;;  %v289_v61 = vmul.f32 %v1827_v49, %v288_v60 }
 0xdc5   :  { %v290_v0 = vadd.f32 %v1827_v49, %v289_v61 }
 0xdc7   :  { %v294_v9 = vsel %vm293_vm10, %v1827_v49, %v290_v0 }
 0xdc8   :  { %v299_v6 = vsel %vm296_vm13, %v298_v4, %v294_v9 }
 0xdc9   :  { %v1236_v10 = vsub.f32 1.0, %v299_v6 }
 0xdcb   :  { %1689 = vset.pattern.permute.xlu0 %v1900_v7  ;;  %v112_v7 = vmax.f32 %v2211_v57, 0.0 }
 0xdcd   :  { %v2230_v22 = vadd.f32 %v166_v17, %v112_v7 }
 0xe1e   :  { %v1178_v8 = vpop.permute.xlu1 %1177 }
 0xe1f   :  { %v1180_v11 = vmul.f32 %v1178_v8, %v1163_v53  ;;  %v355_v8 = vsel %vm339_vm6, %v2211_v57, -inf }
 0xe21   :  { %1182 = vrot.lane.b32.xlu1 %v1180_v11, %s1908_s23 }
 0xe24   :  { %v1168_v13 = vpop.permute.xlu0 %1167 }
 0xe25   :  { %v1169_v20 = vsel %vm827_vm12, %v1168_v13, %v1163_v53 }
 0xe27   :  { %v1188_v43 = vpop.permute.xlu1 %1187 }
 0xe28   :  { %v1190_v15 = vmul.f32 %v1188_v43, %v1169_v20 }
 0xe2a   :  { %1192 = vrot.lane.b32.xlu1 %v1190_v15, %s1909_s24 }
 0xe2c   :  { %v1173_v31 = vpop.permute.xlu0 %1172 }
 0xe2d   :  { %v1175_v36 = vmul.f32 %v1173_v31, %v1169_v20 }
 0xe32   :  { %702 = vperm.xlu1 %1683, %v2230_v22  }
 0xe35   :  { %v1202_v54 = vpop.permute.xlu0 %1201 }
 0xe3a   :  { %1684 = vset.pattern.permute.xlu1 %v1901_v24 }
 0xe3b   :  { %v101_v56 = vpop.f32.mrf.mxu3 }
 0xe93   :  { %v1183_v3 = vpop.permute.xlu1 %1182 }
 0xe94   :  { %v1185_v38 = vadd.f32 %v1183_v3, %v1175_v36 }
 0xe9c   :  { %v1193_v41 = vpop.permute.xlu1 %1192 }
 0xe9d   :  { %v1195_v42 = vadd.f32 %v1193_v41, %v1185_v38 }
 0xe9f   :  { %v1196_v27 = vmax.f32 %v1195_v42, 1e-30 }
 0xea1   :  { %1828 = vlog2.f32 %v1196_v27 }
 0xea4   :  { %v703_v47 = vpop.permute.xlu1 %702 }
 0xea5   :  { %v720_v48 = vmul.f32 %v703_v47, %v672_v46 }
 0xea7   :  { %v1829_v50 = vpop.eup %1828  ;;  %v739_v51 = vsel %vm723_vm5, %v720_v48, -inf }
 0xea8   :  { %v1198_v53 = vmul.f32 0.6931472, %v1829_v50  ;;  %740 = vmax.xlane.f32.xlu1 %v739_v51 }
 0xeaa   :  { %v1204_v58 = vmul.f32 %v1202_v54, %v1198_v53 }
 0xeac   :  { %v1205_v59 = vmul.f32 1.442695, %v1204_v58  ;;  %v2263_v58 = vadd.f32 %v2166_v34, %v101_v56 }
 0xeae   :  { %1830 = vpow2.f32 %v1205_v59  ;;  %v121_v59 = vand.u32 2147483647, %v2263_v58  ;;  %v113_v1 = vmax.f32 %v2263_v58, 0.0  ;;  %v541_v25 = vmul.f32 %v2263_v58, %v2263_v58 }
 0xeb0   :  { %v129_v60 = vsub.f32 0.0, %v121_v59 }
 0xeb2   :  { %v143_v61 = vmul.f32 1.442695, %v129_v60 }
 0xeb4   :  { %v1831_v62 = vpop.eup %1830 }
 0xeb5   :  { %1208 = vrot.lane.b32.xlu2 %v1831_v62, %s1910_s25 }
 0xec1   :  { %1239 = vperm.xlu1 %1684, %v1236_v10  }
 0xec9   :  { %1685 = vset.pattern.permute.xlu1 %v1904_v12 }
 0xede   :  { %356 = vmax.xlane.f32.xlu2 %v355_v8 }
 0xef6   :  { %1232 = vperm.xlu2 %1677, %v299_v6  }
 0xefe   :  { %1687 = vset.pattern.permute.xlu2 %v1905_v16 }
 0xf0f   :  { %v1209_v11 = vpop.permute.xlu2 %1208 }
 0xf10   :  { %v1211_v13 = vsel %vm723_vm5, %v1209_v11, 0.0  ;;  %v358_v11 = vsel %vm339_vm6, %v2263_v58, -inf }
 0xf11   :  { %1212 = vadd.xlane.f32.xlu0 %v1211_v13 }
 0xf1b   :  { %v741_v14 = vpop.xlane.xlu1 %740 }
 0xf1c   :  { %v753_v20 = vsub.f32 %v720_v48, %v741_v14 }
 0xf1e   :  { %v766_v43 = vmul.f32 1.442695, %v753_v20 }
 0xf20   :  { %1832 = vpow2.f32 %v766_v43 }
 0xf26   :  { %v1833_v15 = vpop.eup %1832 }
 0xf27   :  { %v787_v7 = vsel %vm723_vm5, %v1833_v15, 0.0 }
 0xf28   :  { %788 = vadd.xlane.f32.xlu0 %v787_v7  ;;  %v336_v7 = vadd.f32 1.0, %v2230_v22  ;;  %v561_v22 = vsel %vm463_vm0, %v541_v25, 0.0 }
 0xf33   :  { %v1240_v42 = vpop.permute.xlu1 %1239 }
 0xf51   :  { %v357_v17 = vpop.xlane.xlu2 %356 }
 0xf52   :  { %v369_v32 = vsub.f32 %v2211_v57, %v357_v17  ;;  %v1899_v57 = vld [vmem:[%s2446_s3] sm:$0xff] }
 0xf53   :  { %1636 = vmatpush.msra.mxu3 %v1899_v57 }
 0xf54   :  { %v382_v23 = vmul.f32 1.442695, %v369_v32 }
 0xf56   :  { %1834 = vpow2.f32 %v382_v23 }
 0xf59   :  { %v1233_v50 = vpop.permute.xlu2 %1232 }
 0xf5c   :  { %v1835_v21 = vpop.eup %1834 }
 0xf5d   :  { %406 = vrot.lane.b32.xlu0 %v1835_v21, %s1902_s18 }
 0xf84   :  { %v1213_v28 = vpop.xlane.xlu0 %1212 }
 0xf85   :  { %v1214_v29 = vadd.f32 1e-16, %v1213_v28 }
 0xf87   :  { %1836 = vrcp.f32 %v1214_v29  ;;  %v1226_v33 = vand.u32 2147483648, %v1214_v29  ;;  %v1224_v36 = vand.u32 2147483647, %v1214_v29  ;;  %vm1220_vm15 = vweird.f32 %v1214_v29 }
 0xf89   :  { %v1227_v2 = vor.u32 1.1754944e-38, %v1226_v33  ;;  %vm1225_vm3 = vcmp.eq.f32.partialorder %v1224_v36, 8.507059e+37 }
 0xf8d   :  { %v1837_v30 = vpop.eup %1836 }
 0xf8e   :  { %v1216_v3 = vmul.f32 %v1837_v30, %v1214_v29  ;;  %vm1221_vm14 = vweird.f32 %v1837_v30 }
 0xf8f   :  { %vm1222_vm2 = vmor %vm1220_vm15, %vm1221_vm14 }
 0xf90   :  { %v1217_v31 = vsub.f32 1.0, %v1216_v3 }
 0xf92   :  { %v1218_v35 = vmul.f32 %v1837_v30, %v1217_v31 }
 0xf94   :  { %v1219_v37 = vadd.f32 %v1837_v30, %v1218_v35 }
 0xf96   :  { %v1223_v38 = vsel %vm1222_vm2, %v1837_v30, %v1219_v37 }
 0xf97   :  { %v1228_v41 = vsel %vm1225_vm3, %v1227_v2, %v1223_v38 }
 0xf98   :  { %v2256_v40 = vmul.f32 %v1831_v62, %v1228_v41 }
 0xf9a   :  { %v1242_v44 = vmul.f32 %v1240_v42, %v2256_v40 }
 0xf9b   :  { %v789_v27 = vpop.xlane.xlu0 %788 }
 0xf9c   :  { %1244 = vrot.lane.b32.xlu1 %v1242_v44, %s1910_s25  ;;  %1838 = vrcp.f32 %v789_v27 }
 0xf9d   :  { %1840 = vpow2.f32 %v143_v61 }
 0xfa2   :  { %v1839_v48 = vpop.eup %1838 }
 0xfa3   :  { %v809_v49 = vmul.f32 %v1839_v48, %v1833_v15  ;;  %v1841_v62 = vpop.eup %1840  ;;  %v32_v15 = vld [vmem:[%s2448_s0 + $0x38] sm:$0xff] }
 0xfa4   :  { %v153_v63 = vadd.f32 1.0, %v1841_v62  ;;  %1602 = vmatmul.msk.f32.gmra.mxu3 %vm41_vm1, %v32_v15  ;;  %v1609_v62 = vmul.f32 -1.442695, %v2263_v58 }
 0xfa5   :  { %v1235_v51 = vmul.f32 %v1233_v50, %v809_v49 }
 0xfa6   :  { %1842 = vlog2.f32 %v153_v63 }
 0xfac   :  { %v1843_v4 = vpop.eup %1842  ;;  %1619 = vmatmul.msk.f32.vlgmr.msrb.gmra.mxu3 %vm463_vm0, %v2263_v58 }
 0xfad   :  { %v168_v9 = vmul.f32 0.6931472, %v1843_v4 }
 0xfaf   :  { %v2267_v6 = vadd.f32 %v168_v9, %v113_v1 }
 0xfcf   :  { %v407_v46 = vpop.permute.xlu0 %406 }
 0xfd0   :  { %v436_v47 = vsel %vm420_vm11, %v407_v46, 0.0 }
 0xfd1   :  { %437 = vadd.xlane.f32.xlu0 %v436_v47 }
 0xfe5   :  { %707 = vperm.xlu0 %1689, %v2267_v6  }
0x100e   :  { %v1245_v53 = vpop.permute.xlu1 %1244 }
0x100f   :  { %v1247_v54 = vadd.f32 %v1245_v53, %v1235_v51  ;;  %359 = vmax.xlane.f32.xlu0 %v358_v11 }
0x1011   :  { %1248 = vrot.lane.b32.xlu1 %v1247_v54, %s1903_s21 }
0x1027   :  { %v104_v2 = vpop.f32.mrf.mxu3 }
0x1028   :  { %v2292_v41 = vadd.f32 %v2166_v34, %v104_v2 }
0x102a   :  { %1620 = vmatmul.msk.f32.gmra.mxu3 %vm463_vm0, %v2292_v41 }
0x102f   :  { %v529_v51 = vpop.f32.mrf.mxu3 }
0x1044   :  { %v438_v0 = vpop.xlane.xlu0 %437 }
0x1045   :  { %1844 = vrcp.f32 %v438_v0 }
0x104b   :  { %v1845_v10 = vpop.eup %1844 }
0x104c   :  { %v458_v8 = vmul.f32 %v1845_v10, %v1835_v21 }
0x104e   :  { %1261 = vperm.xlu1 %1685, %v458_v8  }
0x1056   :  { %1686 = vset.pattern.permute.xlu1 %v1907_v19 }
0x1057   :  { %1271 = vperm.xlu1 %1686, %v458_v8   ;;  %v708_v59 = vpop.permute.xlu0 %707 }
0x105f   :  { %1688 = vset.pattern.permute.xlu1 %v1906_v18 }
0x1083   :  { %v1249_v13 = vpop.permute.xlu1 %1248 }
0x1084   :  { %v1250_v14 = vsel %vm827_vm12, %v1249_v13, %v1247_v54 }
0x1085   :  { %1251 = vrot.lane.b32.xlu2 %v1250_v14, %s1903_s21 }
0x108d   :  { %1256 = vperm.xlu2 %1687, %v458_v8  }
0x1095   :  { %1690 = vset.pattern.permute.xlu2 %v1901_v24 }
0x10c0   :  { %v1262_v20 = vpop.permute.xlu1 %1261 }
0x10c1   :  { %v1264_v43 = vmul.f32 %v1262_v20, %v1247_v54 }
0x10c3   :  { %1266 = vrot.lane.b32.xlu1 %v1264_v43, %s1908_s23 }
0x10c9   :  { %v1272_v32 = vpop.permute.xlu1 %1271 }
0x10cb   :  { %1285 = vperm.xlu1 %1688, %v336_v7  }
0x10d3   :  { %1692 = vset.pattern.permute.xlu1 %v1907_v19 }
0x10df   :  { %v1252_v17 = vpop.permute.xlu2 %1251 }
0x10e0   :  { %v1253_v23 = vsel %vm827_vm12, %v1252_v17, %v1247_v54 }
0x10e1   :  { %v1274_v21 = vmul.f32 %v1272_v32, %v1253_v23 }
0x10e3   :  { %1276 = vrot.lane.b32.xlu2 %v1274_v21, %s1909_s24 }
0x10e7   :  { %v1257_v26 = vpop.permute.xlu2 %1256 }
0x10e8   :  { %v1259_v28 = vmul.f32 %v1257_v26, %v1253_v23  ;;  %v360_v26 = vpop.xlane.xlu0 %359 }
0x110c   :  { %562 = vadd.xlane.f32.xlu2 %v561_v22 }
0x1135   :  { %v1267_v57 = vpop.permute.xlu1 %1266 }
0x1136   :  { %v1269_v29 = vadd.f32 %v1267_v57, %v1259_v28  ;;  %v370_v57 = vsub.f32 %v2263_v58, %v360_v26 }
0x1138   :  { %v384_v28 = vmul.f32 1.442695, %v370_v57  ;;  %v361_v57 = vsel %vm339_vm6, %v2292_v41, -inf }
0x113d   :  { %v1277_v30 = vpop.permute.xlu2 %1276  ;;  %v1286_v36 = vpop.permute.xlu1 %1285 }
0x113e   :  { %v1279_v3 = vadd.f32 %v1277_v30, %v1269_v29 }
0x1140   :  { %v1280_v31 = vmax.f32 %v1279_v3, 1e-30 }
0x1142   :  { %1846 = vlog2.f32 %v1280_v31 }
0x1148   :  { %v1847_v33 = vpop.eup %1846 }
0x1149   :  { %v1282_v35 = vmul.f32 0.6931472, %v1847_v33 }
0x114b   :  { %v1288_v37 = vmul.f32 %v1286_v36, %v1282_v35 }
0x114d   :  { %v1289_v38 = vmul.f32 1.442695, %v1288_v37 }
0x114f   :  { %1848 = vpow2.f32 %v1289_v38 }
0x1155   :  { %v2296_v42 = vpop.eup %1848 }
0x1156   :  { %1292 = vrot.lane.b32.xlu1 %v2296_v42, %s1910_s25 }
0x117f   :  { %v563_v44 = vpop.xlane.xlu2 %562 }
0x1180   :  { %v573_v27 = vmax.f32 %v563_v44, 1e-16 }
0x1182   :  { %1850 = vrsqrt.f32 %v573_v27  ;;  %vm641_vm4 = vweird.f32 %v573_v27 }
0x1183   :  { %1852 = vpow2.f32 %v1609_v62 }
0x1188   :  { %v1851_v46 = vpop.eup %1850 }
0x1189   :  { %v636_v47 = vmul.f32 %v1851_v46, %v573_v27  ;;  %vm642_vm1 = vweird.f32 %v1851_v46  ;;  %v1853_v63 = vpop.eup %1852 }
0x118a   :  { %vm643_vm7 = vmor %vm641_vm4, %vm642_vm1  ;;  %v209_v0 = vadd.f32 1.0, %v1853_v63 }
0x118b   :  { %v637_v48 = vmul.f32 %v1851_v46, %v636_v47 }
0x118c   :  { %1854 = vrcp.f32 %v209_v0  ;;  %vm306_vm8 = vweird.f32 %v209_v0  ;;  %v312_v13 = vand.u32 2147483648, %v209_v0  ;;  %v310_v20 = vand.u32 2147483647, %v209_v0 }
0x118d   :  { %v638_v49 = vmul.f32 0.5, %v637_v48 }
0x118e   :  { %v313_v43 = vor.u32 1.1754944e-38, %v312_v13  ;;  %vm311_vm13 = vcmp.eq.f32.partialorder %v310_v20, 8.507059e+37  ;;  %v114_v13 = vmax.f32 %v2292_v41, 0.0 }
0x118f   :  { %v639_v50 = vsub.f32 1.5, %v638_v49 }
0x1191   :  { %v640_v34 = vmul.f32 %v1851_v46, %v639_v50 }
0x1192   :  { %v1855_v1 = vpop.eup %1854 }
0x1193   :  { %v644_v53 = vsel %vm643_vm7, %v1851_v46, %v640_v34  ;;  %v302_v10 = vmul.f32 %v1855_v1, %v209_v0  ;;  %vm307_vm9 = vweird.f32 %v1855_v1 }
0x1194   :  { %v661_v54 = vmul.f32 %v644_v53, %v529_v51  ;;  %vm308_vm10 = vmor %vm306_vm8, %vm307_vm9 }
0x1195   :  { %v303_v8 = vsub.f32 1.0, %v302_v10 }
0x1196   :  { %v673_v56 = vmul.f32 %v2191_v5, %v661_v54 }
0x1197   :  { %v304_v11 = vmul.f32 %v1855_v1, %v303_v8 }
0x1198   :  { %v721_v60 = vmul.f32 %v708_v59, %v673_v56 }
0x1199   :  { %v305_v14 = vadd.f32 %v1855_v1, %v304_v11 }
0x119a   :  { %v742_v61 = vsel %vm723_vm5, %v721_v60, -inf }
0x119b   :  { %743 = vmax.xlane.f32.xlu1 %v742_v61  ;;  %v309_v15 = vsel %vm308_vm10, %v1855_v1, %v305_v14 }
0x119c   :  { %v314_v7 = vsel %vm311_vm13, %v313_v43, %v309_v15 }
0x119d   :  { %v1320_v17 = vsub.f32 1.0, %v314_v7 }
0x11c8   :  { %v1293_v4 = vpop.permute.xlu1 %1292 }
0x11c9   :  { %v1295_v9 = vsel %vm723_vm5, %v1293_v4, 0.0 }
0x11ca   :  { %1296 = vadd.xlane.f32.xlu2 %v1295_v9 }
0x11e2   :  { %1323 = vperm.xlu2 %1690, %v1320_v17  }
0x11ea   :  { %1316 = vperm.xlu2 %1690, %v314_v7   ;;  %v337_v7 = vadd.f32 1.0, %v2267_v6 }
0x11f2   :  { %1691 = vset.pattern.permute.xlu2 %v1904_v12 }
0x120e   :  { %v744_v32 = vpop.xlane.xlu1 %743 }
0x120f   :  { %v754_v23 = vsub.f32 %v721_v60, %v744_v32 }
0x1211   :  { %v768_v21 = vmul.f32 1.442695, %v754_v23 }
0x1213   :  { %1856 = vpow2.f32 %v768_v21 }
0x1214   :  { %1858 = vpow2.f32 %v384_v28 }
0x1219   :  { %v1857_v25 = vpop.eup %1856 }
0x121a   :  { %v790_v22 = vsel %vm723_vm5, %v1857_v25, 0.0  ;;  %v1859_v29 = vpop.eup %1858 }
0x121b   :  { %791 = vadd.xlane.f32.xlu1 %v790_v22  ;;  %v542_v22 = vmul.f32 %v2292_v41, %v2292_v41 }
0x121d   :  { %v564_v6 = vsel %vm463_vm0, %v542_v22, 0.0 }
0x1234   :  { %408 = vrot.lane.b32.xlu1 %v1859_v29, %s1902_s18 }
0x123d   :  { %v1297_v30 = vpop.xlane.xlu2 %1296 }
0x123e   :  { %v1298_v3 = vadd.f32 1e-16, %v1297_v30 }
0x1240   :  { %1860 = vrcp.f32 %v1298_v3  ;;  %v1310_v36 = vand.u32 2147483648, %v1298_v3  ;;  %v1308_v2 = vand.u32 2147483647, %v1298_v3  ;;  %vm1304_vm15 = vweird.f32 %v1298_v3 }
0x1242   :  { %v1311_v44 = vor.u32 1.1754944e-38, %v1310_v36  ;;  %vm1309_vm3 = vcmp.eq.f32.partialorder %v1308_v2, 8.507059e+37 }
0x1245   :  { %v1324_v47 = vpop.permute.xlu2 %1323 }
0x1246   :  { %v1861_v31 = vpop.eup %1860 }
0x1247   :  { %v1300_v33 = vmul.f32 %v1861_v31, %v1298_v3  ;;  %vm1305_vm14 = vweird.f32 %v1861_v31 }
0x1248   :  { %vm1306_vm2 = vmor %vm1304_vm15, %vm1305_vm14 }
0x1249   :  { %v1301_v35 = vsub.f32 1.0, %v1300_v33 }
0x124b   :  { %v1302_v37 = vmul.f32 %v1861_v31, %v1301_v35 }
0x124d   :  { %v1303_v38 = vadd.f32 %v1861_v31, %v1302_v37  ;;  %v1317_v51 = vpop.permute.xlu2 %1316 }
0x124f   :  { %v1307_v58 = vsel %vm1306_vm2, %v1861_v31, %v1303_v38 }
0x1250   :  { %v1312_v27 = vsel %vm1309_vm3, %v1311_v44, %v1307_v58 }
0x1251   :  { %v2309_v46 = vmul.f32 %v2296_v42, %v1312_v27  ;;  %v122_v42 = vand.u32 2147483647, %v2292_v41 }
0x1253   :  { %v1326_v48 = vmul.f32 %v1324_v47, %v2309_v46  ;;  %v130_v61 = vsub.f32 0.0, %v122_v42 }
0x1255   :  { %1328 = vrot.lane.b32.xlu2 %v1326_v48, %s1910_s25  ;;  %v145_v62 = vmul.f32 1.442695, %v130_v61 }
0x128e   :  { %v792_v49 = vpop.xlane.xlu1 %791 }
0x128f   :  { %1862 = vrcp.f32 %v792_v49 }
0x1290   :  { %1864 = vpow2.f32 %v145_v62 }
0x1295   :  { %v1863_v34 = vpop.eup %1862 }
0x1296   :  { %v810_v54 = vmul.f32 %v1863_v34, %v1857_v25  ;;  %v1865_v63 = vpop.eup %1864  ;;  %v1610_v25 = vmul.f32 -1.442695, %v2292_v41 }
0x1297   :  { %v154_v1 = vadd.f32 1.0, %v1865_v63 }
0x1298   :  { %v1319_v56 = vmul.f32 %v1317_v51, %v810_v54 }
0x12a6   :  { %v409_v50 = vpop.permute.xlu1 %408 }
0x12a7   :  { %v439_v53 = vsel %vm420_vm11, %v409_v50, 0.0 }
0x12a8   :  { %440 = vadd.xlane.f32.xlu0 %v439_v53 }
0x12af   :  { %v1329_v59 = vpop.permute.xlu2 %1328 }
0x12b0   :  { %v1331_v60 = vadd.f32 %v1329_v59, %v1319_v56 }
0x12b2   :  { %1332 = vrot.lane.b32.xlu1 %v1331_v60, %s1903_s21 }
0x131b   :  { %v441_v0 = vpop.xlane.xlu0 %440 }
0x131c   :  { %1866 = vrcp.f32 %v441_v0 }
0x131d   :  { %1868 = vlog2.f32 %v154_v1 }
0x131e   :  { %1870 = vpow2.f32 %v1610_v25 }
0x1322   :  { %v1867_v4 = vpop.eup %1866 }
0x1323   :  { %v459_v9 = vmul.f32 %v1867_v4, %v1859_v29  ;;  %v1869_v8 = vpop.eup %1868  ;;  %v532_v4 = vpop.f32.mrf.mxu3 }
0x1324   :  { %v1333_v10 = vpop.permute.xlu1 %1332  ;;  %v170_v14 = vmul.f32 0.6931472, %v1869_v8 }
0x1325   :  { %1355 = vperm.xlu1 %1692, %v459_v9   ;;  %1345 = vperm.xlu2 %1691, %v459_v9   ;;  %v1334_v11 = vsel %vm827_vm12, %v1333_v10, %v1331_v60 }
0x1326   :  { %1335 = vrot.lane.b32.xlu0 %v1334_v11, %s1903_s21  ;;  %v2319_v20 = vadd.f32 %v170_v14, %v114_v13 }
0x132d   :  { %1693 = vset.pattern.permute.xlu2 %v1905_v16  ;;  %1694 = vset.pattern.permute.xlu1 %v1906_v18 }
0x132e   :  { %1340 = vperm.xlu2 %1693, %v459_v9   ;;  %712 = vperm.xlu0 %1689, %v2319_v20  }
0x1336   :  { %1695 = vset.pattern.permute.xlu2 %v1901_v24  ;;  %1696 = vset.pattern.permute.xlu0 %v1901_v24  ;;  %v1871_v24 = vpop.eup %1870 }
0x1337   :  { %v210_v26 = vadd.f32 1.0, %v1871_v24 }
0x1339   :  { %1872 = vrcp.f32 %v210_v26  ;;  %vm321_vm1 = vweird.f32 %v210_v26  ;;  %v327_v3 = vand.u32 2147483648, %v210_v26  ;;  %v325_v33 = vand.u32 2147483647, %v210_v26 }
0x133b   :  { %v328_v35 = vor.u32 1.1754944e-38, %v327_v3  ;;  %vm326_vm8 = vcmp.eq.f32.partialorder %v325_v33, 8.507059e+37 }
0x137f   :  { %v1346_v43 = vpop.permute.xlu2 %1345 }
0x1380   :  { %v1348_v15 = vmul.f32 %v1346_v43, %v1331_v60 }
0x1382   :  { %1350 = vrot.lane.b32.xlu1 %v1348_v15, %s1908_s23 }
0x1388   :  { %v1341_v38 = vpop.permute.xlu2 %1340 }
0x138a   :  { %1369 = vperm.xlu1 %1694, %v337_v7  }
0x1392   :  { %1697 = vset.pattern.permute.xlu1 %v1904_v12  ;;  %v1873_v12 = vpop.eup %1872 }
0x1393   :  { %v317_v28 = vmul.f32 %v1873_v12, %v210_v26  ;;  %vm322_vm4 = vweird.f32 %v1873_v12 }
0x1394   :  { %vm323_vm7 = vmor %vm321_vm1, %vm322_vm4 }
0x1395   :  { %v318_v29 = vsub.f32 1.0, %v317_v28 }
0x1397   :  { %v1356_v32 = vpop.permute.xlu1 %1355  ;;  %v319_v30 = vmul.f32 %v1873_v12, %v318_v29 }
0x1398   :  { %v1336_v17 = vpop.permute.xlu0 %1335 }
0x1399   :  { %v1337_v23 = vsel %vm827_vm12, %v1336_v17, %v1331_v60  ;;  %v320_v31 = vadd.f32 %v1873_v12, %v319_v30 }
0x139a   :  { %v1358_v21 = vmul.f32 %v1356_v32, %v1337_v23  ;;  %v1343_v44 = vmul.f32 %v1341_v38, %v1337_v23 }
0x139b   :  { %v324_v36 = vsel %vm323_vm7, %v1873_v12, %v320_v31 }
0x139c   :  { %1360 = vrot.lane.b32.xlu2 %v1358_v21, %s1909_s24  ;;  %v329_v37 = vsel %vm326_vm8, %v328_v35, %v324_v36 }
0x139d   :  { %v1404_v2 = vsub.f32 1.0, %v329_v37 }
0x13a0   :  { %v713_v11 = vpop.permute.xlu0 %712 }
0x13c5   :  { %565 = vadd.xlane.f32.xlu2 %v564_v6 }
0x13cd   :  { %362 = vmax.xlane.f32.xlu2 %v361_v57 }
0x13e5   :  { %1407 = vperm.xlu2 %1695, %v1404_v2  }
0x13ed   :  { %1700 = vset.pattern.permute.xlu2 %v1906_v18 }
0x13f4   :  { %v1351_v58 = vpop.permute.xlu1 %1350 }
0x13f5   :  { %v1353_v27 = vadd.f32 %v1351_v58, %v1343_v44  ;;  %v338_v44 = vadd.f32 1.0, %v2319_v20 }
0x13f6   :  { %v1361_v47 = vpop.permute.xlu2 %1360 }
0x13f7   :  { %v1363_v48 = vadd.f32 %v1361_v47, %v1353_v27 }
0x13f9   :  { %v1364_v49 = vmax.f32 %v1363_v48, 1e-30 }
0x13fb   :  { %1874 = vlog2.f32 %v1364_v49 }
0x13fc   :  { %v1370_v51 = vpop.permute.xlu1 %1369 }
0x1401   :  { %v1875_v50 = vpop.eup %1874 }
0x1402   :  { %v1366_v34 = vmul.f32 0.6931472, %v1875_v50 }
0x1404   :  { %v1372_v53 = vmul.f32 %v1370_v51, %v1366_v34 }
0x1406   :  { %v1373_v54 = vmul.f32 1.442695, %v1372_v53 }
0x1408   :  { %1876 = vpow2.f32 %v1373_v54 }
0x140e   :  { %v1877_v56 = vpop.eup %1876 }
0x140f   :  { %1376 = vrot.lane.b32.xlu1 %v1877_v56, %s1910_s25 }
0x1438   :  { %v566_v59 = vpop.xlane.xlu2 %565 }
0x1439   :  { %v574_v60 = vmax.f32 %v566_v59, 1e-16 }
0x143b   :  { %1878 = vrsqrt.f32 %v574_v60  ;;  %vm651_vm9 = vweird.f32 %v574_v60 }
0x1440   :  { %v363_v7 = vpop.xlane.xlu2 %362 }
0x1441   :  { %v1879_v42 = vpop.eup %1878  ;;  %v371_v17 = vsub.f32 %v2292_v41, %v363_v7 }
0x1442   :  { %v646_v61 = vmul.f32 %v1879_v42, %v574_v60  ;;  %vm652_vm6 = vweird.f32 %v1879_v42 }
0x1443   :  { %vm653_vm10 = vmor %vm651_vm9, %vm652_vm6  ;;  %v386_v32 = vmul.f32 1.442695, %v371_v17 }
0x1444   :  { %v647_v62 = vmul.f32 %v1879_v42, %v646_v61 }
0x1445   :  { %1880 = vpow2.f32 %v386_v32 }
0x1446   :  { %v648_v63 = vmul.f32 0.5, %v647_v62 }
0x1448   :  { %v649_v0 = vsub.f32 1.5, %v648_v63 }
0x144a   :  { %v650_v1 = vmul.f32 %v1879_v42, %v649_v0 }
0x144b   :  { %v1881_v23 = vpop.eup %1880 }
0x144c   :  { %v654_v9 = vsel %vm653_vm10, %v1879_v42, %v650_v1 }
0x144d   :  { %v662_v10 = vmul.f32 %v654_v9, %v532_v4 }
0x144f   :  { %v674_v8 = vmul.f32 %v2191_v5, %v662_v10 }
0x1451   :  { %v722_v13 = vmul.f32 %v713_v11, %v674_v8 }
0x1453   :  { %v745_v14 = vsel %vm723_vm5, %v722_v13, -inf }
0x1454   :  { %746 = vmax.xlane.f32.xlu0 %v745_v14 }
0x1481   :  { %v1377_v43 = vpop.permute.xlu1 %1376 }
0x1482   :  { %v1379_v15 = vsel %vm723_vm5, %v1377_v43, 0.0 }
0x1483   :  { %1380 = vadd.xlane.f32.xlu1 %v1379_v15 }
0x149c   :  { %410 = vrot.lane.b32.xlu1 %v1881_v23, %s1902_s18 }
0x14c7   :  { %v747_v21 = vpop.xlane.xlu0 %746 }
0x14c8   :  { %v755_v25 = vsub.f32 %v722_v13, %v747_v21 }
0x14ca   :  { %v770_v5 = vmul.f32 1.442695, %v755_v25 }
0x14cc   :  { %1882 = vpow2.f32 %v770_v5 }
0x14d2   :  { %v1883_v24 = vpop.eup %1882 }
0x14d3   :  { %v793_v22 = vsel %vm723_vm5, %v1883_v24, 0.0 }
0x14d4   :  { %794 = vadd.xlane.f32.xlu0 %v793_v22 }
0x14e8   :  { %1400 = vperm.xlu0 %1696, %v329_v37   ;;  %v1408_v37 = vpop.permute.xlu2 %1407 }
0x14f0   :  { %1699 = vset.pattern.permute.xlu0 %v1905_v16 }
0x14f6   :  { %v1381_v26 = vpop.xlane.xlu1 %1380 }
0x14f7   :  { %v1382_v6 = vadd.f32 1e-16, %v1381_v26 }
0x14f9   :  { %1884 = vrcp.f32 %v1382_v6  ;;  %v1394_v28 = vand.u32 2147483648, %v1382_v6  ;;  %v1392_v30 = vand.u32 2147483647, %v1382_v6  ;;  %vm1388_vm14 = vweird.f32 %v1382_v6 }
0x14fb   :  { %v1395_v31 = vor.u32 1.1754944e-38, %v1394_v28  ;;  %vm1393_vm2 = vcmp.eq.f32.partialorder %v1392_v30, 8.507059e+37 }
0x14ff   :  { %v1885_v41 = vpop.eup %1884 }
0x1500   :  { %v1384_v12 = vmul.f32 %v1885_v41, %v1382_v6  ;;  %vm1389_vm13 = vweird.f32 %v1885_v41 }
0x1501   :  { %vm1390_vm15 = vmor %vm1388_vm14, %vm1389_vm13 }
0x1502   :  { %v1385_v57 = vsub.f32 1.0, %v1384_v12 }
0x1504   :  { %v1386_v29 = vmul.f32 %v1885_v41, %v1385_v57 }
0x1506   :  { %v1387_v3 = vadd.f32 %v1885_v41, %v1386_v29 }
0x1508   :  { %v1391_v33 = vsel %vm1390_vm15, %v1885_v41, %v1387_v3 }
0x1509   :  { %v1396_v35 = vsel %vm1393_vm2, %v1395_v31, %v1391_v33 }
0x150a   :  { %v1397_v36 = vmul.f32 %v1877_v56, %v1396_v35 }
0x150c   :  { %v1410_v16 = vmul.f32 %v1408_v37, %v1397_v36 }
0x150e   :  { %1412 = vrot.lane.b32.xlu2 %v1410_v16, %s1910_s25  ;;  %v411_v2 = vpop.permute.xlu1 %410 }
0x150f   :  { %v442_v38 = vsel %vm420_vm11, %v411_v2, 0.0 }
0x1537   :  { %443 = vadd.xlane.f32.xlu2 %v442_v38 }
0x1547   :  { %v795_v58 = vpop.xlane.xlu0 %794 }
0x1548   :  { %1886 = vrcp.f32 %v795_v58 }
0x154e   :  { %v1887_v27 = vpop.eup %1886 }
0x154f   :  { %1453 = vperm.xlu2 %1700, %v338_v44   ;;  %v811_v48 = vmul.f32 %v1887_v27, %v1883_v24 }
0x1557   :  { %1494 = vrot.lane.b32.xlu2 %v2146_v45, %s1910_s25 }
0x155a   :  { %v1401_v47 = vpop.permute.xlu0 %1400 }
0x155b   :  { %v1403_v49 = vmul.f32 %v1401_v47, %v811_v48 }
0x155f   :  { %1498 = vrot.lane.b32.xlu2 %v2256_v40, %s1910_s25 }
0x1567   :  { %1502 = vrot.lane.b32.xlu2 %v1397_v36, %s1910_s25 }
0x1568   :  { %v1413_v50 = vpop.permute.xlu2 %1412 }
0x1569   :  { %v1415_v34 = vadd.f32 %v1413_v50, %v1403_v49 }
0x156b   :  { %1416 = vrot.lane.b32.xlu1 %v1415_v34, %s1903_s21 }
0x15aa   :  { %v444_v20 = vpop.xlane.xlu2 %443 }
0x15ab   :  { %1888 = vrcp.f32 %v444_v20 }
0x15b1   :  { %v1889_v51 = vpop.eup %1888 }
0x15b2   :  { %v1454_v53 = vpop.permute.xlu2 %1453  ;;  %v460_v45 = vmul.f32 %v1889_v51, %v1881_v23 }
0x15b4   :  { %1429 = vperm.xlu1 %1697, %v460_v45  }
0x15ba   :  { %v1495_v54 = vpop.permute.xlu2 %1494 }
0x15bb   :  { %1516 = vst.msk [vmem:[%s2451_s7 + $0x10] sm:$0xff] %vm723_vm5, %v1495_v54 }
0x15bc   :  { %1698 = vset.pattern.permute.xlu1 %v1907_v19 }
0x15bd   :  { %1439 = vperm.xlu1 %1698, %v460_v45  }
0x15c2   :  { %v1499_v40 = vpop.permute.xlu2 %1498 }
0x15c3   :  { %1518 = vst.msk [vmem:[%s2451_s7 + $0x20] sm:$0xff] %vm723_vm5, %v1499_v40 }
0x15ca   :  { %v1503_v56 = vpop.permute.xlu2 %1502 }
0x15cb   :  { %1520 = vst.msk [vmem:[%s2451_s7 + $0x30] sm:$0xff] %vm723_vm5, %v1503_v56 }
0x15dd   :  { %v1417_v59 = vpop.permute.xlu1 %1416 }
0x15de   :  { %v1418_v60 = vsel %vm827_vm12, %v1417_v59, %v1415_v34 }
0x15df   :  { %1419 = vrot.lane.b32.xlu0 %v1418_v60, %s1903_s21 }
0x15e7   :  { %1424 = vperm.xlu0 %1699, %v460_v45  }
0x15ef   :  { %1701 = vset.pattern.permute.xlu0 %v1906_v18 }
0x1626   :  { %v1430_v19 = vpop.permute.xlu1 %1429 }
0x1627   :  { %v1432_v42 = vmul.f32 %v1430_v19, %v1415_v34 }
0x1629   :  { %1434 = vrot.lane.b32.xlu1 %v1432_v42, %s1908_s23 }
0x162f   :  { %v1440_v62 = vpop.permute.xlu1 %1439 }
0x1651   :  { %v1420_v61 = vpop.permute.xlu0 %1419 }
0x1652   :  { %v1421_v63 = vsel %vm827_vm12, %v1420_v61, %v1415_v34 }
0x1653   :  { %v1442_v0 = vmul.f32 %v1440_v62, %v1421_v63 }
0x1655   :  { %1444 = vrot.lane.b32.xlu1 %v1442_v0, %s1909_s24 }
0x1659   :  { %v1425_v4 = vpop.permute.xlu0 %1424 }
0x165a   :  { %v1427_v9 = vmul.f32 %v1425_v4, %v1421_v63 }
0x169b   :  { %v1435_v1 = vpop.permute.xlu1 %1434 }
0x169c   :  { %v1437_v10 = vadd.f32 %v1435_v1, %v1427_v9 }
0x16c7   :  { %v1445_v8 = vpop.permute.xlu1 %1444 }
0x16c8   :  { %v1447_v11 = vadd.f32 %v1445_v8, %v1437_v10 }
0x16ca   :  { %v1448_v13 = vmax.f32 %v1447_v11, 1e-30 }
0x16cc   :  { %1890 = vlog2.f32 %v1448_v13 }
0x16d2   :  { %v1891_v18 = vpop.eup %1890 }
0x16d3   :  { %v1450_v14 = vmul.f32 0.6931472, %v1891_v18 }
0x16d5   :  { %v1456_v43 = vmul.f32 %v1454_v53, %v1450_v14 }
0x16d7   :  { %v1457_v15 = vmul.f32 1.442695, %v1456_v43 }
0x16d9   :  { %1892 = vpow2.f32 %v1457_v15 }
0x16df   :  { %v1893_v7 = vpop.eup %1892 }
0x16e0   :  { %1460 = vrot.lane.b32.xlu0 %v1893_v7, %s1910_s25 }
0x16e8   :  { %1490 = vrot.lane.b32.xlu0 %v2059_v55, %s1910_s25 }
0x16f0   :  { %1492 = vrot.lane.b32.xlu0 %v2099_v52, %s1910_s25 }
0x16f8   :  { %1496 = vrot.lane.b32.xlu0 %v2200_v39, %s1910_s25 }
0x1700   :  { %1500 = vrot.lane.b32.xlu0 %v2309_v46, %s1910_s25 }
0x1752   :  { %v1461_v17 = vpop.permute.xlu0 %1460 }
0x1753   :  { %v1463_v32 = vsel %vm723_vm5, %v1461_v17, 0.0 }
0x1754   :  { %1464 = vadd.xlane.f32.xlu1 %v1463_v32 }
0x175a   :  { %v1491_v23 = vpop.permute.xlu0 %1490 }
0x175b   :  { %1514 = vst.msk [vmem:[%s2451_s7] sm:$0xff] %vm723_vm5, %v1491_v23  ;;  %1621 = vmatmul.msk.f32.vlgmr.msra.gmra.mxu2 %vm723_vm5, %v1491_v23 }
0x1762   :  { %v1493_v55 = vpop.permute.xlu0 %1492 }
0x1763   :  { %1515 = vst.msk [vmem:[%s2451_s7 + $0x8] sm:$0xff] %vm723_vm5, %v1493_v55  ;;  %1622 = vmatmul.msk.f32.gmra.mxu2 %vm723_vm5, %v1493_v55 }
0x176a   :  { %v1497_v52 = vpop.permute.xlu0 %1496 }
0x176b   :  { %1517 = vst.msk [vmem:[%s2451_s7 + $0x18] sm:$0xff] %vm723_vm5, %v1497_v52  ;;  %1623 = vmatmul.msk.f32.gmra.mxu2 %vm723_vm5, %v1495_v54 }
0x1772   :  { %v1501_v39 = vpop.permute.xlu0 %1500 }
0x1773   :  { %1519 = vst.msk [vmem:[%s2451_s7 + $0x28] sm:$0xff] %vm723_vm5, %v1501_v39  ;;  %1624 = vmatmul.msk.f32.gmra.mxu2 %vm723_vm5, %v1497_v52 }
0x177b   :  { %1625 = vmatmul.msk.f32.gmra.mxu2 %vm723_vm5, %v1499_v40 }
0x1783   :  { %1626 = vmatmul.msk.f32.gmra.mxu2 %vm723_vm5, %v1501_v39 }
0x178b   :  { %1627 = vmatmul.msk.f32.gmra.mxu2 %vm723_vm5, %v1503_v56 }
0x17c7   :  { %v1465_v46 = vpop.xlane.xlu1 %1464 }
0x17c8   :  { %v1466_v21 = vadd.f32 1e-16, %v1465_v46 }
0x17ca   :  { %1894 = vrcp.f32 %v1466_v21  ;;  %v1478_v22 = vand.u32 2147483648, %v1466_v21  ;;  %v1476_v6 = vand.u32 2147483647, %v1466_v21  ;;  %vm1472_vm12 = vweird.f32 %v1466_v21 }
0x17cc   :  { %v1479_v12 = vor.u32 1.1754944e-38, %v1478_v22  ;;  %vm1477_vm1 = vcmp.eq.f32.partialorder %v1476_v6, 8.507059e+37 }
0x17d0   :  { %v1895_v25 = vpop.eup %1894 }
0x17d1   :  { %v1468_v5 = vmul.f32 %v1895_v25, %v1466_v21  ;;  %vm1473_vm11 = vweird.f32 %v1895_v25 }
0x17d2   :  { %vm1474_vm3 = vmor %vm1472_vm12, %vm1473_vm11 }
0x17d3   :  { %v1469_v24 = vsub.f32 1.0, %v1468_v5 }
0x17d5   :  { %v1470_v26 = vmul.f32 %v1895_v25, %v1469_v24 }
0x17d7   :  { %v1471_v41 = vadd.f32 %v1895_v25, %v1470_v26 }
0x17d9   :  { %v1475_v57 = vsel %vm1474_vm3, %v1895_v25, %v1471_v41 }
0x17da   :  { %v1480_v28 = vsel %vm1477_vm1, %v1479_v12, %v1475_v57 }
0x17db   :  { %v1481_v29 = vmul.f32 %v1893_v7, %v1480_v28 }
0x17dd   :  { %1504 = vrot.lane.b32.xlu0 %v1481_v29, %s1910_s25 }
0x17de   :  { %v1555_v30 = vpop.f32.mrf.mxu2 }
0x17df   :  { %1579 = vst.msk [vmem:[%s2452_s6] sm:$0xff] %vm463_vm0, %v1555_v30 }
0x17e6   :  { %v1558_v3 = vpop.f32.mrf.mxu2 }
0x17e7   :  { %1580 = vst.msk [vmem:[%s2452_s6 + $0x8] sm:$0xff] %vm463_vm0, %v1558_v3 }
0x17ee   :  { %v1561_v31 = vpop.f32.mrf.mxu2 }
0x17ef   :  { %1581 = vst.msk [vmem:[%s2452_s6 + $0x10] sm:$0xff] %vm463_vm0, %v1561_v31 }
0x17f6   :  { %v1564_v33 = vpop.f32.mrf.mxu2 }
0x17f7   :  { %1582 = vst.msk [vmem:[%s2452_s6 + $0x18] sm:$0xff] %vm463_vm0, %v1564_v33 }
0x17fe   :  { %v1567_v35 = vpop.f32.mrf.mxu2 }
0x17ff   :  { %1583 = vst.msk [vmem:[%s2452_s6 + $0x20] sm:$0xff] %vm463_vm0, %v1567_v35 }
0x1806   :  { %v1570_v36 = vpop.f32.mrf.mxu2 }
0x1807   :  { %1584 = vst.msk [vmem:[%s2452_s6 + $0x28] sm:$0xff] %vm463_vm0, %v1570_v36 }
0x180e   :  { %v1573_v37 = vpop.f32.mrf.mxu2 }
0x180f   :  { %1585 = vst.msk [vmem:[%s2452_s6 + $0x30] sm:$0xff] %vm463_vm0, %v1573_v37 }
0x184f   :  { %v1505_v16 = vpop.permute.xlu0 %1504 }
0x1850   :  { %1521 = vst.msk [vmem:[%s2451_s7 + $0x38] sm:$0xff] %vm723_vm5, %v1505_v16  ;;  %1628 = vmatmul.msk.f32.vlgmr.msra.gmra.mxu3 %vm723_vm5, %v1505_v16 }
0x18d3   :  { %v1576_v2 = vpop.f32.mrf.mxu3 }
0x18d4   :  { %1586 = vst.msk [vmem:[%s2452_s6 + $0x38] sm:$0xff] %vm463_vm0, %v1576_v2 }

</bundles_post_ra>
